<compile_context>
chip_gen: v5e
topology: v5e:2x2
jax: 0.10.0
libtpu: 0.0.40
codegen_flags: <defaults>
</compile_context>

<pallas_src>
import jax
import jax.numpy as jnp
from jax.experimental import pallas as pl
from jax.experimental.pallas import tpu as pltpu


def _round_up(a, b):
    return ((a + b - 1) // b) * b


def conv2d_3x3_pallas(x_nchw, w_oihw, *, max_tile_pixels=1792):
    """3x3 conv, stride 1, padding 1, no bias. Input NCHW, weight OIHW (PyTorch)."""
    N, Cin, H, W = x_nchw.shape
    Cout, Cin2, KH, KW = w_oihw.shape
    assert (KH, KW) == (3, 3) and Cin2 == Cin
    HW = H * W
    K = 9 * Cin

    # ---- tiling over the flattened pixel axis --------------------------------
    # The kernel needs to look ahead at most 2*W + 2 pixels past its tile (the
    # bottom-right tap of the 3x3 window); round that halo up to whole lanes.
    HALO = _round_up(2 * W + 2, 128)
    hw_r = _round_up(HW, HALO)
    if hw_r <= max_tile_pixels:
        TP = hw_r                                   # whole image in one tile
    else:
        n_t = pl.cdiv(hw_r, max_tile_pixels)
        TP = _round_up(pl.cdiv(HW, n_t), HALO)      # TP is a multiple of HALO
    n_tiles = pl.cdiv(HW, TP)
    HW_pad = n_tiles * TP
    L = HW_pad + HALO                               # padded flat pixel length

    # ---- cheap input prep (bf16 FIRST, single pad pass, no 9x blow-up) -------
    # x_big[n, ci, (W+1) + h*W + w] = x[n, ci, h, w]; zeros elsewhere.
    # Then x_big[n, ci, p + kh*W + kw] == x_padded[n, ci, h+kh, w+kw] for
    # p = h*W + w, except at width-pad positions which are masked in-kernel.
    x_bf = x_nchw.astype(jnp.bfloat16)
    x_flat = x_bf.reshape(N, Cin, HW)
    front = W + 1
    x_big = jnp.pad(x_flat, ((0, 0), (0, 0), (front, L - front - HW)))

    # Weight as (Cout, K) with K ordered (kh, kw, cin) to match the patch rows.
    w_lhs = w_oihw.transpose(0, 2, 3, 1).reshape(Cout, K).astype(jnp.bfloat16)

    # Multiplicative edge-keep masks per output pixel column:
    #   row 0: keep unless w == 0      (used for kw == 0, i.e. left neighbour)
    #   row 1: keep unless w == W - 1  (used for kw == 2, i.e. right neighbour)
    cols = jnp.arange(HW_pad, dtype=jnp.int32) % W
    edge = jnp.stack([(cols != 0), (cols != W - 1)]).astype(jnp.bfloat16)

    halo_blocks = TP // HALO

    def kernel(w_ref, xa_ref, xb_ref, m_ref, o_ref, win_ref, patch_ref):
        # w_ref:     (Cout, K)        bf16, constant index_map -> VMEM resident
        # xa_ref:    (Cin, TP)        bf16 pixel tile
        # xb_ref:    (Cin, HALO)      bf16 look-ahead halo
        # m_ref:     (2, TP)          bf16 edge-keep masks
        # o_ref:     (Cout, TP)       f32, lane-dense
        # win_ref:   (Cin, TP+HALO)   bf16 VMEM scratch (contiguous window)
        # patch_ref: (K, TP)          bf16 VMEM scratch (fused im2col tile)
        win_ref[:, :TP] = xa_ref[...]
        win_ref[:, TP:] = xb_ref[...]
        left_keep = m_ref[0:1, :]
        right_keep = m_ref[1:2, :]
        for kh in range(3):
            for kw in range(3):
                d = kh * W + kw                       # static shift per tap
                v = win_ref[:, d:d + TP]              # (Cin, TP)
                if kw == 0:
                    v = v * left_keep                 # zero width-pad column
                elif kw == 2:
                    v = v * right_keep
                k0 = (kh * 3 + kw) * Cin
                patch_ref[k0:k0 + Cin, :] = v
        o_ref[...] = jnp.dot(
            w_ref[...], patch_ref[...], preferred_element_type=jnp.float32
        ).astype(o_ref.dtype)

    out = pl.pallas_call(
        kernel,
        out_shape=jax.ShapeDtypeStruct((N, Cout, HW_pad), jnp.float32),
        grid_spec=pltpu.PrefetchScalarGridSpec(
            num_scalar_prefetch=0,
            grid=(N, n_tiles),
            in_specs=[
                # weights: resident across the whole grid
                pl.BlockSpec((Cout, K), lambda n, t: (0, 0)),
                # pixel tile of the flattened padded input
                pl.BlockSpec((pl.Squeezed(), Cin, TP), lambda n, t: (n, 0, t)),
                # halo: the HALO lanes right after this tile (same array again)
                pl.BlockSpec((pl.Squeezed(), Cin, HALO),
                             lambda n, t: (n, 0, (t + 1) * halo_blocks)),
                # edge masks for this tile
                pl.BlockSpec((2, TP), lambda n, t: (0, t)),
            ],
            out_specs=pl.BlockSpec((pl.Squeezed(), Cout, TP),
                                   lambda n, t: (n, 0, t)),
            scratch_shapes=[
                pltpu.VMEM((Cin, TP + HALO), jnp.bfloat16),
                pltpu.VMEM((K, TP), jnp.bfloat16),
            ],
        ),
        compiler_params=pltpu.CompilerParams(
            dimension_semantics=("parallel", "parallel")),
    )(w_lhs, x_big, x_big, edge)

    # Channel-major already (NCHW): drop pixel padding, fold HW -> (H, W).
    return out[:, :, :HW].reshape(N, Cout, H, W).astype(x_nchw.dtype)


if __name__ == "__main__":
    key = jax.random.PRNGKey(0)
    kx, kw_key = jax.random.split(key)

    # Small shapes consistent with the module: Conv2d(64, 64, 3, 1, 1)
    N, Cin, Cout, H, W = 2, 64, 64, 16, 16

    x = jax.random.normal(kx, (N, Cin, H, W), dtype=jnp.float32)
    w = jax.random.normal(kw_key, (Cout, Cin, 3, 3), dtype=jnp.float32) * (
        1.0 / (3 * 3 * Cin) ** 0.5)

    # Reference with matching operand precision (bf16 operands, f32 accumulation).
    ref = jax.lax.conv_general_dilated(
        x.astype(jnp.bfloat16), w.astype(jnp.bfloat16),
        window_strides=(1, 1), padding=((1, 1), (1, 1)),
        dimension_numbers=("NCHW", "OIHW", "NCHW"),
        preferred_element_type=jnp.float32)
    ref = jax.block_until_ready(ref)
    ref_f32 = jax.lax.conv_general_dilated(
        x, w, window_strides=(1, 1), padding=((1, 1), (1, 1)),
        dimension_numbers=("NCHW", "OIHW", "NCHW"))

    # 1) default tiling (single pixel tile at this size)
    out = jax.block_until_ready(conv2d_3x3_pallas(x, w))
    assert out.shape == (N, Cout, H, W)
    assert jnp.allclose(out, ref, atol=1e-2, rtol=1e-2)
    assert jnp.allclose(out, ref_f32, atol=5e-2, rtol=5e-2)

    # 2) force multiple pixel tiles to exercise the halo / multi-tile path
    out2 = jax.block_until_ready(conv2d_3x3_pallas(x, w, max_tile_pixels=128))
    assert jnp.allclose(out2, ref, atol=1e-2, rtol=1e-2)

    print("KERNEL_OK")
</pallas_src>

<mosaic_0001>
module attributes {stable_mosaic.version = 11 : i64} {
  func.func @kernel(%arg0: i32, %arg1: i32, %arg2: memref<64x576xbf16, #tpu.memory_space<vmem>>, %arg3: memref<1x64x256xbf16, #tpu.memory_space<vmem>>, %arg4: memref<1x64x128xbf16, #tpu.memory_space<vmem>>, %arg5: memref<2x256xbf16, #tpu.memory_space<vmem>>, %arg6: memref<1x64x256xf32, #tpu.memory_space<vmem>>, %arg7: memref<64x384xbf16, #tpu.memory_space<vmem>>, %arg8: memref<576x256xbf16, #tpu.memory_space<vmem>>) attributes {dimension_semantics = [#tpu.dimension_semantics<parallel>, #tpu.dimension_semantics<parallel>], iteration_bounds = array<i64: 2, 1>, scalar_prefetch = 0 : i64, scratch_operands = 2 : i64, tpu.core_type = #tpu.core_type<tc>, window_params = [{pipeline_mode = #tpu.pipeline_mode<synchronous>, transform_indices = @transform_0, window_bounds = array<i64: 64, 576>}, {transform_indices = @transform_1, window_bounds = array<i64: 1, 64, 256>}, {transform_indices = @transform_2, window_bounds = array<i64: 1, 64, 128>}, {transform_indices = @transform_3, window_bounds = array<i64: 2, 256>}, {transform_indices = @transform_4, window_bounds = array<i64: 1, 64, 256>}]} {
    %c0 = arith.constant 0 : index
    %c0_0 = arith.constant 0 : index
    %c0_1 = arith.constant 0 : index
    %0 = vector.load %arg3[%c0, %c0_0, %c0_1] : memref<1x64x256xbf16, #tpu.memory_space<vmem>>, vector<1x64x256xbf16>
    %1 = vector.shape_cast %0 : vector<1x64x256xbf16> to vector<64x256xbf16>
    %c0_2 = arith.constant 0 : index
    %c0_3 = arith.constant 0 : index
    %2 = vector.load %arg7[%c0_2, %c0_3] : memref<64x384xbf16, #tpu.memory_space<vmem>>, vector<64x256xbf16>
    tpu.vector_store %arg7[%c0_2, %c0_3], %1 {strides = array<i32>} : memref<64x384xbf16, #tpu.memory_space<vmem>>, vector<64x256xbf16>,
    %c0_4 = arith.constant 0 : index
    %c0_5 = arith.constant 0 : index
    %c0_6 = arith.constant 0 : index
    %3 = vector.load %arg4[%c0_4, %c0_5, %c0_6] : memref<1x64x128xbf16, #tpu.memory_space<vmem>>, vector<1x64x128xbf16>
    %4 = vector.shape_cast %3 : vector<1x64x128xbf16> to vector<64x128xbf16>
    %c0_7 = arith.constant 0 : index
    %c256 = arith.constant 256 : index
    %5 = vector.load %arg7[%c0_7, %c256] : memref<64x384xbf16, #tpu.memory_space<vmem>>, vector<64x128xbf16>
    tpu.vector_store %arg7[%c0_7, %c256], %4 {strides = array<i32>} : memref<64x384xbf16, #tpu.memory_space<vmem>>, vector<64x128xbf16>,
    %c0_8 = arith.constant 0 : index
    %c0_9 = arith.constant 0 : index
    %6 = vector.load %arg5[%c0_8, %c0_9] : memref<2x256xbf16, #tpu.memory_space<vmem>>, vector<1x256xbf16>
    %c1 = arith.constant 1 : index
    %c0_10 = arith.constant 0 : index
    %7 = vector.load %arg5[%c1, %c0_10] : memref<2x256xbf16, #tpu.memory_space<vmem>>, vector<1x256xbf16>
    %c0_11 = arith.constant 0 : index
    %c0_12 = arith.constant 0 : index
    %8 = vector.load %arg7[%c0_11, %c0_12] : memref<64x384xbf16, #tpu.memory_space<vmem>>, vector<64x256xbf16>
    %9 = vector.broadcast %6 : vector<1x256xbf16> to vector<64x256xbf16>
    %10 = arith.mulf %8, %9 : vector<64x256xbf16>
    %c0_13 = arith.constant 0 : index
    %c0_14 = arith.constant 0 : index
    %11 = vector.load %arg8[%c0_13, %c0_14] : memref<576x256xbf16, #tpu.memory_space<vmem>>, vector<64x256xbf16>
    tpu.vector_store %arg8[%c0_13, %c0_14], %10 {strides = array<i32>} : memref<576x256xbf16, #tpu.memory_space<vmem>>, vector<64x256xbf16>,
    %c0_15 = arith.constant 0 : index
    %c1_16 = arith.constant 1 : index
    %12 = vector.load %arg7[%c0_15, %c1_16] : memref<64x384xbf16, #tpu.memory_space<vmem>>, vector<64x256xbf16>
    %c64 = arith.constant 64 : index
    %c0_17 = arith.constant 0 : index
    %13 = vector.load %arg8[%c64, %c0_17] : memref<576x256xbf16, #tpu.memory_space<vmem>>, vector<64x256xbf16>
    tpu.vector_store %arg8[%c64, %c0_17], %12 {strides = array<i32>} : memref<576x256xbf16, #tpu.memory_space<vmem>>, vector<64x256xbf16>,
    %c0_18 = arith.constant 0 : index
    %c2 = arith.constant 2 : index
    %14 = vector.load %arg7[%c0_18, %c2] : memref<64x384xbf16, #tpu.memory_space<vmem>>, vector<64x256xbf16>
    %15 = vector.broadcast %7 : vector<1x256xbf16> to vector<64x256xbf16>
    %16 = arith.mulf %14, %15 : vector<64x256xbf16>
    %c128 = arith.constant 128 : index
    %c0_19 = arith.constant 0 : index
    %17 = vector.load %arg8[%c128, %c0_19] : memref<576x256xbf16, #tpu.memory_space<vmem>>, vector<64x256xbf16>
    tpu.vector_store %arg8[%c128, %c0_19], %16 {strides = array<i32>} : memref<576x256xbf16, #tpu.memory_space<vmem>>, vector<64x256xbf16>,
    %c0_20 = arith.constant 0 : index
    %c16 = arith.constant 16 : index
    %18 = vector.load %arg7[%c0_20, %c16] : memref<64x384xbf16, #tpu.memory_space<vmem>>, vector<64x256xbf16>
    %19 = vector.broadcast %6 : vector<1x256xbf16> to vector<64x256xbf16>
    %20 = arith.mulf %18, %19 : vector<64x256xbf16>
    %c192 = arith.constant 192 : index
    %c0_21 = arith.constant 0 : index
    %21 = vector.load %arg8[%c192, %c0_21] : memref<576x256xbf16, #tpu.memory_space<vmem>>, vector<64x256xbf16>
    tpu.vector_store %arg8[%c192, %c0_21], %20 {strides = array<i32>} : memref<576x256xbf16, #tpu.memory_space<vmem>>, vector<64x256xbf16>,
    %c0_22 = arith.constant 0 : index
    %c17 = arith.constant 17 : index
    %22 = vector.load %arg7[%c0_22, %c17] : memref<64x384xbf16, #tpu.memory_space<vmem>>, vector<64x256xbf16>
    %c256_23 = arith.constant 256 : index
    %c0_24 = arith.constant 0 : index
    %23 = vector.load %arg8[%c256_23, %c0_24] : memref<576x256xbf16, #tpu.memory_space<vmem>>, vector<64x256xbf16>
    tpu.vector_store %arg8[%c256_23, %c0_24], %22 {strides = array<i32>} : memref<576x256xbf16, #tpu.memory_space<vmem>>, vector<64x256xbf16>,
    %c0_25 = arith.constant 0 : index
    %c18 = arith.constant 18 : index
    %24 = vector.load %arg7[%c0_25, %c18] : memref<64x384xbf16, #tpu.memory_space<vmem>>, vector<64x256xbf16>
    %25 = vector.broadcast %7 : vector<1x256xbf16> to vector<64x256xbf16>
    %26 = arith.mulf %24, %25 : vector<64x256xbf16>
    %c320 = arith.constant 320 : index
    %c0_26 = arith.constant 0 : index
    %27 = vector.load %arg8[%c320, %c0_26] : memref<576x256xbf16, #tpu.memory_space<vmem>>, vector<64x256xbf16>
    tpu.vector_store %arg8[%c320, %c0_26], %26 {strides = array<i32>} : memref<576x256xbf16, #tpu.memory_space<vmem>>, vector<64x256xbf16>,
    %c0_27 = arith.constant 0 : index
    %c32 = arith.constant 32 : index
    %28 = vector.load %arg7[%c0_27, %c32] : memref<64x384xbf16, #tpu.memory_space<vmem>>, vector<64x256xbf16>
    %29 = vector.broadcast %6 : vector<1x256xbf16> to vector<64x256xbf16>
    %30 = arith.mulf %28, %29 : vector<64x256xbf16>
    %c384 = arith.constant 384 : index
    %c0_28 = arith.constant 0 : index
    %31 = vector.load %arg8[%c384, %c0_28] : memref<576x256xbf16, #tpu.memory_space<vmem>>, vector<64x256xbf16>
    tpu.vector_store %arg8[%c384, %c0_28], %30 {strides = array<i32>} : memref<576x256xbf16, #tpu.memory_space<vmem>>, vector<64x256xbf16>,
    %c0_29 = arith.constant 0 : index
    %c33 = arith.constant 33 : index
    %32 = vector.load %arg7[%c0_29, %c33] : memref<64x384xbf16, #tpu.memory_space<vmem>>, vector<64x256xbf16>
    %c448 = arith.constant 448 : index
    %c0_30 = arith.constant 0 : index
    %33 = vector.load %arg8[%c448, %c0_30] : memref<576x256xbf16, #tpu.memory_space<vmem>>, vector<64x256xbf16>
    tpu.vector_store %arg8[%c448, %c0_30], %32 {strides = array<i32>} : memref<576x256xbf16, #tpu.memory_space<vmem>>, vector<64x256xbf16>,
    %c0_31 = arith.constant 0 : index
    %c34 = arith.constant 34 : index
    %34 = vector.load %arg7[%c0_31, %c34] : memref<64x384xbf16, #tpu.memory_space<vmem>>, vector<64x256xbf16>
    %35 = vector.broadcast %7 : vector<1x256xbf16> to vector<64x256xbf16>
    %36 = arith.mulf %34, %35 : vector<64x256xbf16>
    %c512 = arith.constant 512 : index
    %c0_32 = arith.constant 0 : index
    %37 = vector.load %arg8[%c512, %c0_32] : memref<576x256xbf16, #tpu.memory_space<vmem>>, vector<64x256xbf16>
    tpu.vector_store %arg8[%c512, %c0_32], %36 {strides = array<i32>} : memref<576x256xbf16, #tpu.memory_space<vmem>>, vector<64x256xbf16>,
    %c0_33 = arith.constant 0 : index
    %c0_34 = arith.constant 0 : index
    %38 = vector.load %arg2[%c0_33, %c0_34] : memref<64x576xbf16, #tpu.memory_space<vmem>>, vector<64x576xbf16>
    %c0_35 = arith.constant 0 : index
    %c0_36 = arith.constant 0 : index
    %39 = vector.load %arg8[%c0_35, %c0_36] : memref<576x256xbf16, #tpu.memory_space<vmem>>, vector<576x256xbf16>
    %cst = arith.constant dense<0.000000e+00> : vector<64x256xf32>
    %40 = tpu.matmul %38, %39, %cst {dimension_numbers = #tpu.dot_dimension_numbers<[1], [0], [0], [1], [0, 0, 1, 1], [], []>} : vector<64x576xbf16>, vector<576x256xbf16>, vector<64x256xf32> -> vector<64x256xf32>
    %c0_37 = arith.constant 0 : index
    %c0_38 = arith.constant 0 : index
    %c0_39 = arith.constant 0 : index
    %41 = vector.load %arg6[%c0_37, %c0_38, %c0_39] : memref<1x64x256xf32, #tpu.memory_space<vmem>>, vector<1x64x256xf32>
    %42 = vector.shape_cast %41 : vector<1x64x256xf32> to vector<64x256xf32>
    %43 = vector.shape_cast %40 : vector<64x256xf32> to vector<1x64x256xf32>
    tpu.vector_store %arg6[%c0_37, %c0_38, %c0_39], %43 {strides = array<i32>} : memref<1x64x256xf32, #tpu.memory_space<vmem>>, vector<1x64x256xf32>,
    return
  }
  func.func @transform_0(%arg0: i32, %arg1: i32) -> (i32, i32) {
    %c0_i32 = arith.constant 0 : i32
    %c0_i32_0 = arith.constant 0 : i32
    %c0_i32_1 = arith.constant 0 : i32
    return %c0_i32, %c0_i32_0 : i32, i32
  }
  func.func @transform_1(%arg0: i32, %arg1: i32) -> (i32, i32, i32) {
    %c0_i32 = arith.constant 0 : i32
    %c0_i32_0 = arith.constant 0 : i32
    return %arg0, %c0_i32, %arg1 : i32, i32, i32
  }
  func.func @transform_2(%arg0: i32, %arg1: i32) -> (i32, i32, i32) {
    %c1_i32 = arith.constant 1 : i32
    %0 = arith.addi %arg1, %c1_i32 : i32
    %c2_i32 = arith.constant 2 : i32
    %1 = arith.muli %0, %c2_i32 : i32
    %c0_i32 = arith.constant 0 : i32
    %c0_i32_0 = arith.constant 0 : i32
    return %arg0, %c0_i32, %1 : i32, i32, i32
  }
  func.func @transform_3(%arg0: i32, %arg1: i32) -> (i32, i32) {
    %c0_i32 = arith.constant 0 : i32
    %c0_i32_0 = arith.constant 0 : i32
    return %c0_i32, %arg1 : i32, i32
  }
  func.func @transform_4(%arg0: i32, %arg1: i32) -> (i32, i32, i32) {
    %c0_i32 = arith.constant 0 : i32
    %c0_i32_0 = arith.constant 0 : i32
    return %arg0, %c0_i32, %arg1 : i32, i32, i32
  }
}

</mosaic_0001>

<bundles_post_ra>
// kernel: tpu_custom_call.1
= control target key start
LH: loop header
LB: loop body
LE: loop exit
PB: predicated region body
PF: predicated region fallthrough
CT: control target
= control target key end

     0   :  { %s4844_s0 = inlined_call_operand.hbm [shape: bf16[64,576], index: 0, kind: input, shape index: {}]   ;;  %s4845_s1 = inlined_call_operand.hbm [shape: bf16[2,64,384], index: 1, kind: input, shape index: {}]   ;;  %s4846_s2 = inlined_call_operand.hbm [shape: bf16[2,64,384], index: 2, kind: input, shape index: {}]   ;;  %s4847_s3 = inlined_call_operand.vmem [shape: bf16[2,256], index: 3, kind: input, shape index: {}]   ;;  %s4848_s4 = inlined_call_operand.hbm [shape: f32[2,64,256], index: 4, kind: output, shape index: {}]  }
   0x1   :  { %4853 = sst [smem:[#allocation17_spill]] %s4844_s0 }
   0x2   :  { %4854 = sst [smem:[#allocation18_spill]] %s4845_s1 }
   0x3   :  { %9 = vsyncpa [#allocation5], 0 }
   0x4   :  { %10 = vsyncpa [#allocation8], 0 }
   0x5   :  { %12 = vsyncpa [#allocation8 + $0x1], 0 }
   0x6   :  { %13 = vsyncpa [#allocation6], 0 }
   0x7   :  { %15 = vsyncpa [#allocation6 + $0x1], 0  ;;  %s3609_s15 = smov 0   ;;  %s3611_s16 = smov 0  }
   0x8   :  { %s3613_s17 = smov 0   ;;  %s3615_s18 = smov 0  }
   0x9   :  { %s3617_s19 = smov 0   ;;  %s3619_s20 = smov 0  }
   0xa LB: > { %s33_s21 = sadd.s32 1, %s3556_s19  ;;  %s63_s22 = sadd.s32 1, %s3548_s17  ;;  %s3560_s20 = sphi %s3619_s20, %s21_s20   ;;  %s3556_s19 = sphi %s3617_s19, %s4883_s19   ;;  %s3552_s18 = sphi %s3615_s18, %s4882_s18   ;;  %s3548_s17 = sphi %s3613_s17, %s4881_s17   ;;  %s3544_s16 = sphi %s3611_s16, %s4880_s16   ;;  %s3540_s15 = sphi %s3609_s15, %s4879_s15  }
   0xb   : > { %p35_p0 = scmp.ge.s32.totalorder %s33_s21, 2  ;;  %p70_p1 = scmp.ne.s32.totalorder %s3548_s17, %s3544_s16 }
   0xc   : > { %p71_p2 = scmp.eq.s32.totalorder %s3560_s20, 0  ;;  %p2758_p3 = scmp.ge.s32.totalorder %s3560_s20, 2 }
   0xd   : > { %s4885_s21 = smov (%p35_p0, %s33_s21), 0  ;;  %p3285_p5 = scmp.lt.s32.totalorder %s3560_s20, 2 }
   0xe   : > { %4855 = sst [smem:[#allocation14_spill]] %s4885_s21  ;;  %p3650_p4 = por %p71_p2, %p70_p1 }
   0xf   : > { %s58_s24 = ssub.s32 %s3556_s19, %s4885_s21  ;;  %s208_s25 = sand.u32 1, %s3560_s20  }
  0x10   : > { %p61_p6 = scmp.eq.s32.totalorder %s58_s24, 0  ;;  %s210_s26 = sand.u32 1, %s3548_s17  }
  0x11   : > { %s3258_s27 = smul.u32 96, %s3556_s19  ;;  %s2759_s29 = sshll.u32 %s210_s26, 6 }
  0x12   : > { %s3661_s28 = scalar_select %p61_p6, %s3548_s17, %s63_s22  }
  0x13   : > { %s4857_s1 = sld [smem:[#allocation18_spill]]  ;;  %s212_s8 = scalar_lea.vmem [#allocation7], %s2759_s29 }
  0x14   : > { %s230_s9 = sshll.u32 %s212_s8, 4  ;;  %p3672_p7 = pnand %p3285_p5, %p3650_p4  ;;  %s231_s9 = int_to_ptr.vmem [resolvable:$true] %s230_s9 }
  0x15   : > { %s3676_s11 = scalar_lea.sflag [#allocation8], %s208_s25  ;;  %s4849_s12 = smov 192  }
  0x16   : > { %s3563_s13 = smov 128   ;;  %s3564_s14 = smov 8  }
  0x17   : > { %s2761_s22 = sshll.u32 %s210_s26, 5  ;;  %s3686_s29 = sadd.s32 4294967295, %s3560_s20  }
  0x18   : > { %s244_s23 = scalar_lea.vmem [#allocation9], %s2761_s22  ;;  %s2754_s25 = sadd.s32 4294967294, %s3560_s20  }
  0x19   : > { %s225_s6 = scalar_lea.hbm %s4857_s1, %s3258_s27  ;;  %s3682_s24 = sshll.u32 %s244_s23, 4  ;;  %s256_s24 = int_to_ptr.vmem [resolvable:$true] %s3682_s24 }
  0x1a   : > { %s228_s7 = sshll.u32 %s225_s6, 4  ;;  %p76_p8 = scmp.ne.s32.totalorder %s3544_s16, %s3540_s15  ;;  %s229_s7 = int_to_ptr.hbm [resolvable:$true] %s228_s7 }
  0x1b   : > { %3276 = dma.hbm_to_vmem [thread:$0]  (!%p3672_p7), %s229_s7, 1024, %s231_s9, %s3676_s11, %s4849_s12, %s3563_s13, %s3564_s14  }
  0x1c   : > { %p77_p9 = scmp.eq.s32.totalorder %s3686_s29, 0  ;;  %p160_p10 = scmp.eq.s32.totalorder %s3686_s29, 1 }
  0x1d   : > { %p166_p11 = scmp.eq.s32.totalorder %s2754_s25, 1  ;;  %p2755_p13 = scmp.ge.s32.totalorder %s3560_s20, 1 }
  0x1e   : > { %p3695_p12 = por %p77_p9, %p76_p8  ;;  %p3703_p0 = por %p160_p10, %p70_p1 }
  0x1f   : > { %p3707_p2 = por %p166_p11, %p76_p8  ;;  %p173_p4 = scmp.lt.s32.totalorder %s3560_s20, 3 }
  0x20   : > { %s4862_s0 = sld [smem:[#allocation17_spill]]  ;;  %s3565_s13 = smov [#allocation4]  }
  0x21   : > { %p3715_p5 = pnand %p2755_p13, %p173_p4  ;;  %s186_s14 = sshll.u32 %s3565_s13, 4  ;;  %s187_s14 = int_to_ptr.vmem [resolvable:$true] %s186_s14 }
  0x22   : > { %s2664_s25 = scalar_lea.hbm %s4846_s2, %s3258_s27  ;;  %s3566_s12 = smov 320  }
  0x23   : > { %p3269_p1 = pneg %p3715_p5  ;;  %s2665_s6 = scalar_lea.hbm %s2664_s25, 8 }
  0x24   : > { %s253_s7 = sshll.u32 %s2665_s6, 4  ;;  %s3568_s1 = smov 64   ;;  %s254_s7 = int_to_ptr.hbm [resolvable:$true] %s253_s7 }
  0x25   : > { %p3270_p6 = pnand %p3269_p1, %p77_p9  ;;  %s3569_s21 = smov 4  }
  0x26   : > { %s184_s8 = sshll.u32 %s4862_s0, 4  ;;  %s3567_s0 = smov 20   ;;  %s185_s8 = int_to_ptr.hbm [resolvable:$true] %s184_s8 }
  0x27   : > { %3272 = dma.hbm_to_vmem [thread:$0]  (!%p3270_p6), %s185_s8, 2560, %s187_s14, [#allocation5], %s3566_s12, %s3566_s12, %s3567_s0  }
  0x28   : > { %s4864_s13 = smov 192   ;;  %267 = sbr.rel (%p3715_p5) target bundleno = 867 (0x363), region = 36 }
  0x29   : > { %3279 = dma.hbm_to_vmem [thread:$0]  (!%p3672_p7), %s254_s7, 512, %s256_s24, %s3676_s11, %s4864_s13, %s3568_s1, %s3569_s21  }
  0x2d   : > { %3527 = dma.done.wait (%p77_p9), [#allocation5], 2560  }
  0x2e   : > { %3529 = vsyncadd (%p77_p9), [#allocation5], 4294964736  ;;  %s274_s27 = sand.u32 1, %s3686_s29   ;;  %s3742_s0 = sand.u32 1, %s3544_s16  }
  0x2f   : > { %s2765_s10 = sshll.u32 %s3742_s0, 6  ;;  %s275_s12 = scalar_lea.sflag [#allocation8], %s274_s27 }
  0x30   : > { %s3745_s8 = scalar_lea.vmem [#allocation7], %s2765_s10 }
  0x31   : > { %3531 = dma.done.wait (%p3695_p12), %s275_s12, 1536  }
  0x32   : > { %3533 = vsyncadd (%p3695_p12), %s275_s12, 4294965760  ;;  %s2766_s1 = sshll.u32 %s3742_s0, 5  ;;  %v3756_v1 = vld [vmem:[%s3745_s8] sm:$0xff]  ;;  %s3570_s11 = smov 127   ;;  %v3761_v2 = vld [vmem:[%s3745_s8 + $0x8] sm:$0xff]  ;;  %vm518_vm0 = vcmask 1043456  }
  0x33   : > { %s3752_s21 = scalar_lea.vmem [#allocation9], %s2766_s1  ;;  %470 = vrot.lane.b32.xlu0 %v3756_v1, %s3570_s11  ;;  %345 = vst [vmem:[#allocation2] sm:$0xff] %v3756_v1  ;;  %v3765_v3 = vld [vmem:[%s3745_s8 + $0x10] sm:$0xff]  ;;  %474 = vrot.lane.b32.xlu2 %v3761_v2, %s3570_s11  ;;  %v369_v4 = vld [vmem:[%s4847_s3] sm:$0x3]  ;;  %s3571_s26 = smov 16  }
  0x34   : > { %v353_v0 = vld [vmem:[%s3752_s21] sm:$0xf]  ;;  %347 = vst [vmem:[#allocation2 + $0x18] sm:$0xff] %v3765_v3  ;;  %v354_v5 = vld [vmem:[%s3752_s21 + $0x4] sm:$0xf]  ;;  %v3776_v6 = vld [vmem:[%s3745_s8 + $0x30] sm:$0xff] }
  0x35   : > { %361 = vst [vmem:[#allocation2 + $0x8] sm:$0xf] %v353_v0  ;;  %v360_v7 = vld [vmem:[%s3752_s21 + $0x1c] sm:$0xf]  ;;  %v355_v9 = vld [vmem:[%s3752_s21 + $0x8] sm:$0xf] }
  0x36   : > { %346 = vst [vmem:[#allocation2 + $0xc] sm:$0xff] %v3761_v2  ;;  %v3781_v8 = vld [vmem:[%s3745_s8 + $0x18] sm:$0xff]  ;;  %v3793_v12 = vld [vmem:[%s3745_s8 + $0x20] sm:$0xff]  ;;  %v358_v15 = vld [vmem:[%s3752_s21 + $0x14] sm:$0xf]  ;;  %s3572_s9 = smov 2  }
  0x37   : > { %379 = vst [vmem:[#allocation1] ss:$9 sm:$0xff] %v369_v4  ;;  %v3789_v11 = vld [vmem:[%s3745_s8 + $0x38] sm:$0xff]  ;;  %v357_v21 = vld [vmem:[%s3752_s21 + $0x10] sm:$0xf]  ;;  %v3815_v40 = vld [vmem:[%s3745_s8 + $0x28] sm:$0xff] }
  0x38   : > { %351 = vst [vmem:[#allocation2 + $0x48] sm:$0xff] %v3776_v6  ;;  %v356_v28 = vld [vmem:[%s3752_s21 + $0xc] sm:$0xf]  ;;  %v359_v39 = vld [vmem:[%s3752_s21 + $0x18] sm:$0xf]  ;;  %s3573_s14 = smov 18  }
  0x39   : > { %362 = vst [vmem:[#allocation2 + $0x14] sm:$0xf] %v354_v5  ;;  %s3574_s22 = smov 32   ;;  %s3575_s23 = smov 34   ;;  %vm520_vm1 = vcmask 1039360   ;;  %vm799_vm2 = vcmask 130048  }
  0x3a   : > { %348 = vst [vmem:[#allocation2 + $0x24] sm:$0xff] %v3781_v8  ;;  %s3576_s25 = smov 95   ;;  %s3577_s6 = smov 112   ;;  %vm611_vm3 = vcmask 15360   ;;  %vm1098_vm4 = vcmask 146432   ;;  %vm1507_vm5 = vcmask 777216  }
  0x3b   : > { %478 = vrot.lane.b32.xlu0 %v3765_v3, %s3570_s11  ;;  %368 = vst [vmem:[#allocation2 + $0x5c] sm:$0xf] %v360_v7  ;;  %s3578_s7 = smov 126   ;;  %s3579_s13 = smov 110   ;;  %vm1284_vm6 = vcmask 261120   ;;  %vm1583_vm7 = vcmask 277504  }
  0x3c   : > { %v439_v10 = vld [vmem:[#allocation2 + $0x8] sm:$0xf]  ;;  %363 = vst [vmem:[#allocation2 + $0x20] sm:$0xf] %v355_v9  ;;  %vm909_vm8 = vcmask 916480   ;;  %s3580_s27 = smov 111  }
  0x3d   : > { %472 = vrot.lane.b32.xlu1 %v439_v10, %s3570_s11  ;;  %352 = vst [vmem:[#allocation2 + $0x54] sm:$0xff] %v3789_v11  ;;  %s3581_s10 = smov 96   ;;  %vm721_vm9 = vcmask 1031168   ;;  %vm1208_vm10 = vcmask 900096   ;;  %s3582_s12 = smov 94   ;;  %vm1394_vm11 = vcmask 785408  }
  0x3e   : > { %v380_v13 = vld [vmem:[#allocation1] sm:$0xff]  ;;  %v381_v14 = vld [vmem:[#allocation1 + $0x9] sm:$0xff]  ;;  %349 = vst [vmem:[#allocation2 + $0x30] sm:$0xff] %v3793_v12  ;;  %vm1022_vm12 = vcmask 908288   ;;  %vm1693_vm13 = vcmask 769024   ;;  %vm2281_vm14 = vcmask 523264  }
  0x3f   : > { %v382_v16 = vpack.i.b16 %v380_v13, %v380_v13  ;;  %v385_v17 = vpack.i.b16 %v381_v14, %v381_v14  ;;  %568 = vst [vmem:[#allocation1] ss:$9 sm:$0xff] %v369_v4  ;;  %s2767_s8 = sshll.u32 %s3742_s0, 7  ;;  %s3241_s21 = sshll.u32 %s3552_s18, 7 }
  0x40   : > { %v441_v18 = vld [vmem:[#allocation2 + $0x14] sm:$0xf]  ;;  %366 = vst [vmem:[#allocation2 + $0x44] sm:$0xf] %v358_v15  ;;  %s4762_s1 = scalar_lea.vmem [#allocation10], %s2767_s8  ;;  %s2614_s29 = scalar_lea.hbm %s4848_s4, %s3241_s21 }
  0x41   : > { %v384_v19 = vperm.slane %v382_v16, 0  ;;  %v387_v20 = vperm.slane %v385_v17, 0  ;;  %476 = vrot.lane.b32.xlu2 %v441_v18, %s3570_s11  ;;  %365 = vst [vmem:[#allocation2 + $0x38] sm:$0xf] %v357_v21  ;;  %s2601_s18 = scalar_lea.sflag [#allocation6], %s3742_s0 }
  0x42   : > { %364 = vst [vmem:[#allocation2 + $0x2c] sm:$0xf] %v356_v28  ;;  %v453_v31 = vld [vmem:[#allocation2 + $0x5c] sm:$0xf] }
  0x43   : > { %v3799_v22 = vunpack.c.l.bf16 %v384_v19  ;;  %v3801_v23 = vunpack.c.l.bf16 %v387_v20  ;;  %v443_v25 = vld [vmem:[#allocation2 + $0x20] sm:$0xf]  ;;  %367 = vst [vmem:[#allocation2 + $0x50] sm:$0xf] %v359_v39  ;;  %v768_v7 = vld [vmem:[#allocation2 + $0x5c] sm:$0xf] }
  0x44   : > { %350 = vst [vmem:[#allocation2 + $0x3c] sm:$0xff] %v3815_v40  ;;  %v792_v14 = vunpack.c.l.bf16 %v768_v7  ;;  %v758_v39 = vld [vmem:[#allocation2 + $0x20] sm:$0xf]  ;;  %v3889_v7 = vunpack.c.l.bf16 %v3781_v8 }
  0x45   : > { %494 = vrot.lane.b32.xlu1 %v3776_v6, %s3570_s11  ;;  %v3358_v24 = vpack.i.bf16 %v3801_v23, %v3799_v22 }
  0x46   : > { %v569_v26 = vld [vmem:[#allocation1] sm:$0xff]  ;;  %v570_v27 = vld [vmem:[#allocation1 + $0x9] sm:$0xff] }
  0x47   : > { %3359 = vrot.lane.b32.xlu0 %v3358_v24, %s3571_s26  ;;  %v571_v29 = vshrl.u32 %v569_v26, 16  ;;  %v575_v30 = vshrl.u32 %v570_v27, 16  ;;  %v449_v43 = vld [vmem:[#allocation2 + $0x44] sm:$0xf] }
  0x48   : > { %v447_v42 = vld [vmem:[#allocation2 + $0x38] sm:$0xf]  ;;  %v764_v10 = vld [vmem:[#allocation2 + $0x44] sm:$0xf] }
  0x49   : > { %480 = vrot.lane.b32.xlu2 %v443_v25, %s3570_s11  ;;  %v572_v32 = vpack.i.b16 %v571_v29, %v571_v29  ;;  %v576_v33 = vpack.i.b16 %v575_v30, %v575_v30  ;;  %v445_v44 = vld [vmem:[#allocation2 + $0x2c] sm:$0xf]  ;;  %v786_v16 = vunpack.c.l.bf16 %v764_v10  ;;  %v762_v21 = vld [vmem:[#allocation2 + $0x38] sm:$0xf] }
  0x4a   : > { %v451_v41 = vld [vmem:[#allocation2 + $0x50] sm:$0xf]  ;;  %v760_v28 = vld [vmem:[#allocation2 + $0x2c] sm:$0xf]  ;;  %v783_v30 = vunpack.c.l.bf16 %v762_v21 }
  0x4b   : > { %v574_v34 = vperm.slane %v572_v32, 0  ;;  %v578_v35 = vperm.slane %v576_v33, 0  ;;  %v1439_v46 = vld [vmem:[#allocation2 + $0x50] sm:$0xf] }
  0x4c   : > { %v766_v9 = vld [vmem:[#allocation2 + $0x50] sm:$0xf] }
  0x4d   : > { %500 = vrot.lane.b32.xlu1 %v453_v31, %s3570_s11  ;;  %v603_v36 = vunpack.c.l.bf16 %v574_v34  ;;  %v604_v37 = vunpack.c.l.bf16 %v578_v35  ;;  %v789_v15 = vunpack.c.l.bf16 %v766_v9  ;;  %v780_v35 = vunpack.c.l.bf16 %v760_v28 }
  0x4e   : > { %v3892_v9 = vunpack.c.h.bf16 %v3781_v8 }
  0x4f   : > { %482 = vrot.lane.b32.xlu0 %v3781_v8, %s3570_s11  ;;  %v3363_v38 = vpack.i.bf16 %v604_v37, %v603_v36 }
  0x51   : > { %496 = vrot.lane.b32.xlu2 %v451_v41, %s3570_s11 }
  0x55   : > { %3364 = vrot.lane.b32.xlu1 %v3363_v38, %s3572_s9  ;;  %s2615_s9 = sshll.u32 %s4762_s1, 4  ;;  %s2616_s9 = int_to_ptr.vmem [resolvable:$true] %s2615_s9 }
  0x57   : > { %498 = vrot.lane.b32.xlu0 %v3789_v11, %s3570_s11 }
  0x59   : > { %490 = vrot.lane.b32.xlu2 %v3815_v40, %s3570_s11 }
  0x5d   : > { %3369 = vrot.lane.b32.xlu1 %v3363_v38, %s3573_s14  ;;  %s2617_s14 = sshll.u32 %s2614_s29, 4  ;;  %s2618_s14 = int_to_ptr.hbm [resolvable:$true] %s2617_s14 }
  0x5f   : > { %486 = vrot.lane.b32.xlu0 %v3793_v12, %s3570_s11 }
  0x61   : > { %3374 = vrot.lane.b32.xlu2 %v3358_v24, %s3574_s22  ;;  %v754_v24 = vld [vmem:[#allocation2 + $0x8] sm:$0xf]  ;;  %s3488_s22 = sshra.s32 %s2618_s14, 4  ;;  %s3489_s22 = int_to_ptr.hbm [resolvable:$true] %s3488_s22 }
  0x62   : > { %v771_v34 = vunpack.c.l.bf16 %v754_v24  ;;  %p3495_p10 = scmp.lt.s32.totalorder %s3489_s22, %s4848_s4 }
  0x65   : > { %488 = vrot.lane.b32.xlu1 %v447_v42, %s3570_s11 }
  0x67   : > { %492 = vrot.lane.b32.xlu0 %v449_v43, %s3570_s11 }
  0x69   : > { %1486 = vrot.lane.b32.xlu2 %v3789_v11, %s3576_s25 }
  0x6d   : > { %1484 = vrot.lane.b32.xlu1 %v1439_v46, %s3576_s25 }
  0x6f   : > { %484 = vrot.lane.b32.xlu0 %v445_v44, %s3570_s11  ;;  %v777_v44 = vunpack.c.l.bf16 %v758_v39 }
  0x77   : > { %3379 = vrot.lane.b32.xlu0 %v3363_v38, %s3575_s23  ;;  %s3490_s23 = scalar_lea.hbm %s3489_s22, 128 }
  0x78   : > { %p3491_p7 = scmp.ne.s32.totalorder %s3489_s22, %s3490_s23 }
  0x7a   : > { %p3492_p8 = pnand %p3491_p7, %p3703_p0 }
  0x7c   : > { %p3493_p9 = pneg %p3492_p8 }
  0x7f   : > { %1482 = vrot.lane.b32.xlu0 %v3776_v6, %s3576_s25 }
  0x8d   : > { %v475_v45 = vpop.permute.xlu2 %474 }
  0x8e   : > { %v504_v47 = vrot.slane %v475_v45, 4 }
  0x9b   : > { %v477_v48 = vpop.permute.xlu2 %476 }
  0x9c   : > { %v505_v49 = vrot.slane %v477_v48, 4  ;;  %v3860_v48 = vunpack.c.h.bf16 %v3815_v40 }
  0x9e   : > { %v522_v50 = vsel %vm518_vm0, %v504_v47, %v505_v49  ;;  %v3857_v47 = vunpack.c.l.bf16 %v3815_v40 }
  0x9f   : > { %v523_v51 = vsel %vm520_vm1, %v475_v45, %v522_v50  ;;  %v3863_v50 = vunpack.c.l.bf16 %v3789_v11 }
  0xa0   : > { %545 = vst [vmem:[#allocation3 + $0x48] sm:$0xff] %v523_v51  ;;  %v3866_v51 = vunpack.c.h.bf16 %v3789_v11 }
  0xa3   : > { %v481_v53 = vpop.permute.xlu2 %480 }
  0xa4   : > { %v507_v54 = vrot.slane %v481_v53, 4 }
  0xa5   : > { %v471_v52 = vpop.permute.xlu0 %470 }
  0xa6   : > { %v502_v58 = vrot.slane %v471_v52, 4 }
  0xab   : > { %v497_v0 = vpop.permute.xlu2 %496 }
  0xac   : > { %v515_v4 = vrot.slane %v497_v0, 4 }
  0xad   : > { %v479_v56 = vpop.permute.xlu0 %478 }
  0xae   : > { %v506_v59 = vrot.slane %v479_v56, 4 }
  0xaf   : > { %v473_v55 = vpop.permute.xlu1 %472 }
  0xb0   : > { %v503_v57 = vrot.slane %v473_v55, 4  ;;  %v524_v61 = vsel %vm518_vm0, %v506_v59, %v507_v54 }
  0xb1   : > { %v525_v63 = vsel %vm520_vm1, %v479_v56, %v524_v61 }
  0xb2   : > { %v519_v60 = vsel %vm518_vm0, %v502_v58, %v503_v57  ;;  %546 = vst [vmem:[#allocation3 + $0x50] sm:$0xff] %v525_v63  ;;  %v756_v58 = vld [vmem:[#allocation2 + $0x14] sm:$0xf] }
  0xb3   : > { %v521_v62 = vsel %vm520_vm1, %v471_v52, %v519_v60  ;;  %v774_v0 = vunpack.c.l.bf16 %v756_v58  ;;  %v769_v58 = vunpack.c.l.bf16 %v3756_v1 }
  0xb4   : > { %544 = vst [vmem:[#allocation3 + $0x40] sm:$0xff] %v521_v62 }
  0xb7   : > { %v495_v5 = vpop.permute.xlu1 %494 }
  0xb8   : > { %v514_v13 = vrot.slane %v495_v5, 4 }
  0xb9   : > { %v3360_v18 = vpop.permute.xlu0 %3359 }
  0xba   : > { %v532_v17 = vsel %vm518_vm0, %v514_v13, %v515_v4  ;;  %v3841_v20 = vunpack.i.h.bf16 %v3360_v18  ;;  %v3853_v41 = vunpack.i.l.bf16 %v3360_v18  ;;  %v3895_v13 = vunpack.c.l.bf16 %v3793_v12 }
  0xbb   : > { %v533_v19 = vsel %vm520_vm1, %v495_v5, %v532_v17  ;;  %v561_v17 = vld [vmem:[#allocation2 + $0x38] sm:$0xf] }
  0xbc   : > { %550 = vst [vmem:[#allocation3 + $0x70] sm:$0xff] %v533_v19  ;;  %v827_v25 = vmul.f32 %v3841_v20, %v792_v14  ;;  %v824_v26 = vmul.f32 %v3841_v20, %v789_v15  ;;  %v821_v27 = vmul.f32 %v3841_v20, %v786_v16  ;;  %v818_v37 = vmul.f32 %v3841_v20, %v783_v30 }
  0xbd   : > { %v806_v38 = vmul.f32 %v3841_v20, %v771_v34  ;;  %v815_v42 = vmul.f32 %v3841_v20, %v780_v35  ;;  %v3870_v52 = vsel %vm799_vm2, %v3853_v41, %v3841_v20  ;;  %v812_v56 = vmul.f32 %v3841_v20, %v777_v44 }
  0xbe   : > { %v843_v31 = vpack.c.bf16 %v827_v25, %v827_v25  ;;  %v841_v32 = vpack.c.bf16 %v824_v26, %v824_v26  ;;  %v839_v33 = vpack.c.bf16 %v821_v27, %v821_v27  ;;  %v837_v45 = vpack.c.bf16 %v818_v37, %v818_v37 }
  0xbf   : > { %v501_v29 = vpop.permute.xlu1 %500  ;;  %v829_v46 = vpack.c.bf16 %v806_v38, %v806_v38  ;;  %v835_v49 = vpack.c.bf16 %v815_v42, %v815_v42  ;;  %v819_v57 = vmul.f32 %v3853_v41, %v3857_v47  ;;  %v820_v11 = vmul.f32 %v3870_v52, %v3860_v48 }
  0xc0   : > { %890 = vrot.lane.b32.xlu2 %v843_v31, %s3577_s6  ;;  %886 = vrot.lane.b32.xlu0 %v841_v32, %s3577_s6  ;;  %v517_v53 = vrot.slane %v501_v29, 4  ;;  %v825_v59 = vmul.f32 %v3853_v41, %v3863_v50  ;;  %v826_v60 = vmul.f32 %v3870_v52, %v3866_v51  ;;  %v833_v4 = vpack.c.bf16 %v812_v56, %v812_v56  ;;  %v491_v31 = vpop.permute.xlu2 %490 }
  0xc1   : > { %882 = vrot.lane.b32.xlu1 %v839_v33, %s3577_s6  ;;  %v3849_v36 = vpop.permute.xlu0 %482  ;;  %v838_v5 = vpack.c.bf16 %v820_v11, %v819_v57  ;;  %v3898_v14 = vunpack.c.h.bf16 %v3793_v12  ;;  %v809_v16 = vmul.f32 %v3841_v20, %v774_v0  ;;  %v813_v18 = vmul.f32 %v3853_v41, %v3889_v7 }
  0xc2   : > { %v842_v10 = vpack.c.bf16 %v826_v60, %v825_v59  ;;  %v814_v19 = vmul.f32 %v3870_v52, %v3892_v9  ;;  %v816_v21 = vmul.f32 %v3853_v41, %v3895_v13  ;;  %v593_v28 = vunpack.c.l.bf16 %v561_v17 }
  0xc3   : > { %v817_v24 = vmul.f32 %v3870_v52, %v3898_v14  ;;  %v2906_v25 = vld [vmem:[#allocation3 + $0x70] sm:$0xf]  ;;  %v831_v20 = vpack.c.bf16 %v809_v16, %v809_v16  ;;  %v3917_v32 = vunpack.c.l.bf16 %v3776_v6  ;;  %v3920_v33 = vunpack.c.h.bf16 %v3776_v6 }
  0xc4   : > { %v834_v35 = vpack.c.bf16 %v814_v19, %v813_v18  ;;  %v3923_v42 = vunpack.c.l.bf16 %v3765_v3  ;;  %v512_v6 = vrot.slane %v491_v31, 4 }
  0xc5   : > { %v836_v39 = vpack.c.bf16 %v817_v24, %v816_v21  ;;  %v822_v57 = vmul.f32 %v3853_v41, %v3917_v32  ;;  %v823_v11 = vmul.f32 %v3870_v52, %v3920_v33 }
  0xc6   : > { %v810_v59 = vmul.f32 %v3853_v41, %v3923_v42 }
  0xc7   : > { %v3365_v43 = vpop.permute.xlu1 %3364  ;;  %v840_v17 = vpack.c.bf16 %v823_v11, %v822_v57 }
  0xc8   : > { %878 = vrot.lane.b32.xlu2 %v837_v45, %s3577_s6  ;;  %862 = vrot.lane.b32.xlu0 %v829_v46, %s3577_s6  ;;  %v3912_v26 = vunpack.i.h.bf16 %v3365_v43  ;;  %v3914_v29 = vunpack.i.l.bf16 %v3365_v43  ;;  %v3926_v43 = vunpack.c.h.bf16 %v3765_v3  ;;  %v773_v3 = vunpack.c.h.bf16 %v3761_v2 }
  0xc9   : > { %874 = vrot.lane.b32.xlu1 %v835_v49, %s3577_s6  ;;  %v499_v54 = vpop.permute.xlu0 %498 }
  0xca   : > { %v516_v55 = vrot.slane %v499_v54, 4  ;;  %v630_v45 = vmul.f32 %v3912_v26, %v593_v28  ;;  %v811_v60 = vmul.f32 %v3870_v52, %v3926_v43  ;;  %v808_v18 = vmul.f32 %v3870_v52, %v773_v3 }
  0xcb   : > { %v3971_v21 = vmul.f32 %v3914_v29, %v3889_v7 }
  0xcc   : > { %v534_v61 = vsel %vm518_vm0, %v516_v55, %v517_v53  ;;  %v559_v53 = vld [vmem:[#allocation2 + $0x2c] sm:$0xf]  ;;  %v3939_v55 = vsel %vm611_vm3, %v3914_v29, %v3912_v26  ;;  %v832_v24 = vpack.c.bf16 %v811_v60, %v810_v59 }
  0xcd   : > { %v535_v62 = vsel %vm520_vm1, %v499_v54, %v534_v61  ;;  %v772_v54 = vunpack.c.l.bf16 %v3761_v2  ;;  %v770_v61 = vunpack.c.h.bf16 %v3756_v1  ;;  %v3981_v28 = vmul.f32 %v3892_v9, %v3939_v55 }
  0xce   : > { %551 = vst [vmem:[#allocation3 + $0x78] sm:$0xff] %v535_v62  ;;  %v3953_v62 = vmul.f32 %v3914_v29, %v3857_v47 }
  0xcf   : > { %v3886_v63 = vpop.permute.xlu1 %3369  ;;  %v807_v16 = vmul.f32 %v3853_v41, %v772_v54 }
  0xd0   : > { %870 = vrot.lane.b32.xlu2 %v833_v4, %s3577_s6  ;;  %880 = vrot.lane.b32.xlu0 %v838_v5, %s3577_s6  ;;  %v649_v4 = vpack.c.bf16 %v630_v45, %v630_v45  ;;  %v590_v5 = vunpack.c.l.bf16 %v559_v53 }
  0xd1   : > { %888 = vrot.lane.b32.xlu1 %v842_v10, %s3577_s6  ;;  %v487_v15 = vpop.permute.xlu0 %486  ;;  %v3958_v10 = vmul.f32 %v3860_v48, %v3939_v55 }
  0xd2   : > { %v510_v27 = vrot.slane %v487_v15, 4 }
  0xd3   : > { %v650_v19 = vpack.c.bf16 %v3958_v10, %v3953_v62 }
  0xd5   : > { %v3184_v34 = vld [vmem:[#allocation3 + $0x74] sm:$0xf0] }
  0xd6   : > { %v2907_v38 = vor.u32 %v3184_v34, %v2906_v25  ;;  %v804_v25 = vmul.f32 %v3853_v41, %v769_v58  ;;  %v627_v41 = vmul.f32 %v3912_v26, %v590_v5  ;;  %v567_v34 = vld [vmem:[#allocation2 + $0x5c] sm:$0xf] }
  0xd7   : > { %v489_v30 = vpop.permute.xlu1 %488 }
  0xd8   : > { %v511_v37 = vrot.slane %v489_v30, 4  ;;  %866 = vrot.lane.b32.xlu2 %v831_v20, %s3577_s6  ;;  %872 = vrot.lane.b32.xlu0 %v834_v35, %s3577_s6  ;;  %v508_v20 = vrot.slane %v3849_v36, 4  ;;  %v3985_v30 = vunpack.i.l.bf16 %v3886_v63  ;;  %v646_v35 = vpack.c.bf16 %v3981_v28, %v3971_v21 }
  0xd9   : > { %876 = vrot.lane.b32.xlu1 %v836_v39, %s3577_s6  ;;  %v493_v46 = vpop.permute.xlu0 %492  ;;  %2294 = vmatpush.bf16.msra.mxu0 %v2907_v38  ;;  %v565_v39 = vld [vmem:[#allocation2 + $0x50] sm:$0xf]  ;;  %v647_v53 = vpack.c.bf16 %v627_v41, %v627_v41 }
  0xda   : > { %v528_v44 = vsel %vm518_vm0, %v510_v27, %v511_v37  ;;  %v513_v56 = vrot.slane %v493_v46, 4  ;;  %3242 = vmatpush.bf16.msra.mxu2 %v2907_v38  ;;  %v805_v27 = vmul.f32 %v3870_v52, %v770_v61  ;;  %v3994_v37 = vunpack.i.h.bf16 %v3886_v63 }
  0xdb   : > { %v529_v49 = vsel %vm520_vm1, %v487_v15, %v528_v44  ;;  %v830_v44 = vpack.c.bf16 %v808_v18, %v807_v16  ;;  %v599_v59 = vunpack.c.l.bf16 %v565_v39  ;;  %v4005_v60 = vmul.f32 %v3985_v30, %v3857_v47  ;;  %v557_v39 = vld [vmem:[#allocation2 + $0x20] sm:$0xf] }
  0xdc   : > { %548 = vst [vmem:[#allocation3 + $0x60] sm:$0xff] %v529_v49  ;;  %v530_v0 = vsel %vm518_vm0, %v512_v6, %v513_v56  ;;  %v828_v6 = vpack.c.bf16 %v805_v27, %v804_v25  ;;  %v602_v56 = vunpack.c.l.bf16 %v567_v34  ;;  %v3999_v57 = vsel %vm1098_vm4, %v3985_v30, %v3994_v37  ;;  %v2882_v34 = vld [vmem:[#allocation3 + $0x40] sm:$0xf] }
  0xdd   : > { %v531_v15 = vsel %vm520_vm1, %v491_v31, %v530_v0  ;;  %v1067_v31 = vld [vmem:[#allocation2 + $0x50] sm:$0xf]  ;;  %v4009_v0 = vmul.f32 %v3999_v57, %v3860_v48  ;;  %v4013_v5 = vmul.f32 %v3985_v30, %v3863_v50  ;;  %v4028_v16 = vmul.f32 %v3999_v57, %v3920_v33 }
  0xde   : > { %549 = vst [vmem:[#allocation3 + $0x68] sm:$0xff] %v531_v15  ;;  %v1090_v46 = vunpack.c.l.bf16 %v1067_v31  ;;  %v4017_v15 = vmul.f32 %v3999_v57, %v3866_v51  ;;  %v4044_v25 = vmul.f32 %v3985_v30, %v3895_v13  ;;  %v639_v27 = vmul.f32 %v3912_v26, %v602_v56 }
  0xdf   : > { %v1137_v48 = vpack.c.bf16 %v4009_v0, %v4005_v60  ;;  %v4052_v41 = vmul.f32 %v3999_v57, %v3898_v14  ;;  %v636_v31 = vmul.f32 %v3912_v26, %v599_v59  ;;  %v4067_v56 = vmul.f32 %v3999_v57, %v3892_v9  ;;  %v1485_v2 = vpop.permute.xlu1 %1484 }
  0xe0   : > { %884 = vrot.lane.b32.xlu2 %v840_v17, %s3577_s6  ;;  %690 = vrot.lane.b32.xlu0 %v649_v4, %s3578_s7  ;;  %v1123_v47 = vmul.f32 %v3994_v37, %v1090_v46  ;;  %v4032_v17 = vmul.f32 %v3985_v30, %v3923_v42  ;;  %v655_v46 = vpack.c.bf16 %v639_v27, %v639_v27  ;;  %v587_v27 = vunpack.c.l.bf16 %v557_v39 }
  0xe1   : > { %868 = vrot.lane.b32.xlu1 %v832_v24, %s3577_s6  ;;  %v485_v52 = vpop.permute.xlu0 %484  ;;  %v4040_v24 = vmul.f32 %v3999_v57, %v3926_v43 }
  0xe2   : > { %v509_v38 = vrot.slane %v485_v52, 4  ;;  %v555_v52 = vld [vmem:[#allocation2 + $0x14] sm:$0xf] }
  0xe3   : > { %v2898_v45 = vld [vmem:[#allocation3 + $0x60] sm:$0xf] }
  0xe4   : > { %v526_v49 = vsel %vm518_vm0, %v508_v20, %v509_v38  ;;  %v4059_v38 = vld [vmem:[#allocation2 + $0xc] sm:$0xff] }
  0xe5   : > { %v527_v11 = vsel %vm520_vm1, %v3849_v36, %v526_v49  ;;  %v3182_v63 = vld [vmem:[#allocation3 + $0x64] sm:$0xf0]  ;;  %v4021_v36 = vmul.f32 %v3985_v30, %v3917_v32  ;;  %v563_v49 = vld [vmem:[#allocation2 + $0x44] sm:$0xf]  ;;  %v4070_v59 = vunpack.c.l.bf16 %v4059_v38 }
  0xe6   : > { %547 = vst [vmem:[#allocation3 + $0x58] sm:$0xff] %v527_v11  ;;  %v2899_v4 = vor.u32 %v3182_v63, %v2898_v45  ;;  %v1140_v45 = vpack.c.bf16 %v1123_v47, %v1123_v47  ;;  %v653_v63 = vpack.c.bf16 %v636_v31, %v636_v31  ;;  %v3178_v47 = vld [vmem:[#allocation3 + $0x44] sm:$0xf0] }
  0xe7   : > { %v4079_v9 = vmul.f32 %v3985_v30, %v4070_v59  ;;  %v2883_v39 = vor.u32 %v3178_v47, %v2882_v34  ;;  %v584_v34 = vunpack.c.l.bf16 %v555_v52 }
  0xe8   : > { %686 = vrot.lane.b32.xlu0 %v647_v53, %s3578_s7  ;;  %860 = vrot.lane.b32.xlu2 %v828_v6, %s3577_s6  ;;  %v4063_v53 = vmul.f32 %v3985_v30, %v3889_v7  ;;  %v596_v7 = vunpack.c.l.bf16 %v563_v49  ;;  %v638_v49 = vmul.f32 %v3866_v51, %v3939_v55  ;;  %v623_v51 = vmul.f32 %v3926_v43, %v3939_v55 }
  0xe9   : > { %864 = vrot.lane.b32.xlu1 %v830_v44, %s3577_s6  ;;  %2295 = vmatpush.bf16.msra.mxu0 %v2899_v4  ;;  %v2890_v44 = vld [vmem:[#allocation3 + $0x50] sm:$0xf]  ;;  %v634_v43 = vmul.f32 %v3914_v29, %v3917_v32 }
  0xea   : > { %3243 = vmatpush.bf16.msra.mxu2 %v2899_v4  ;;  %v4073_v4 = vunpack.c.h.bf16 %v4059_v38 }
  0xec   : > { %v4083_v31 = vmul.f32 %v3999_v57, %v4073_v4 }
  0xed   : > { %v3180_v6 = vld [vmem:[#allocation3 + $0x54] sm:$0xf0] }
  0xee   : > { %v2891_v11 = vor.u32 %v3180_v6, %v2890_v44  ;;  %v1129_v44 = vpack.c.bf16 %v4083_v31, %v4079_v9  ;;  %v637_v6 = vmul.f32 %v3914_v29, %v3863_v50  ;;  %v622_v50 = vmul.f32 %v3914_v29, %v3923_v42 }
  0xef   : > { %v619_v42 = vmul.f32 %v3914_v29, %v772_v54 }
  0xf0   : > { %2296 = vmatpush.bf16.msra.mxu0 %v2891_v11  ;;  %3244 = vmatpush.bf16.msra.mxu2 %v2891_v11  ;;  %v624_v11 = vmul.f32 %v3912_v26, %v587_v27  ;;  %v654_v20 = vpack.c.bf16 %v638_v49, %v637_v6  ;;  %v621_v27 = vmul.f32 %v3912_v26, %v584_v34 }
  0xf1   : > { %1185 = vrot.lane.b32.xlu0 %v1140_v45, %s3579_s13  ;;  %702 = vrot.lane.b32.xlu1 %v655_v46, %s3578_s7  ;;  %v633_v45 = vmul.f32 %v3912_v26, %v596_v7  ;;  %v553_v46 = vld [vmem:[#allocation2 + $0x8] sm:$0xf]  ;;  %v644_v52 = vpack.c.bf16 %v623_v51, %v622_v50  ;;  %v629_v50 = vmul.f32 %v3898_v14, %v3939_v55 }
  0xf2   : > { %698 = vrot.lane.b32.xlu2 %v653_v63, %s3578_s7  ;;  %v645_v63 = vpack.c.bf16 %v624_v11, %v624_v11  ;;  %v581_v18 = vunpack.c.l.bf16 %v553_v46  ;;  %v643_v6 = vpack.c.bf16 %v621_v27, %v621_v27  ;;  %v3375_v46 = vpop.permute.xlu2 %3374  ;;  %v1441_v27 = vld [vmem:[#allocation2 + $0x5c] sm:$0xf]  ;;  %v617_v14 = vmul.f32 %v770_v61, %v3939_v55 }
  0xf3   : > { %v651_v47 = vpack.c.bf16 %v633_v45, %v633_v45 }
  0xf4   : > { %2297 = vmatpush.bf16.msra.mxu0 %v2883_v39  ;;  %3245 = vmatpush.bf16.msra.mxu2 %v2883_v39  ;;  %v618_v7 = vmul.f32 %v3912_v26, %v581_v18  ;;  %v1069_v39 = vld [vmem:[#allocation2 + $0x5c] sm:$0xf]  ;;  %v620_v26 = vmul.f32 %v773_v3, %v3939_v55  ;;  %v635_v18 = vmul.f32 %v3920_v33, %v3939_v55  ;;  %v1503_v3 = vrot.slane %v1485_v2, 4  ;;  %v1065_v2 = vld [vmem:[#allocation2 + $0x44] sm:$0xf] }
  0xf5   : > { %v1093_v11 = vunpack.c.l.bf16 %v1069_v39  ;;  %v628_v33 = vmul.f32 %v3914_v29, %v3895_v13  ;;  %v616_v13 = vmul.f32 %v3914_v29, %v769_v58  ;;  %v4165_v58 = vld [vmem:[#allocation2 + $0x3c] sm:$0xff] }
  0xf6   : > { %v641_v49 = vpack.c.bf16 %v618_v7, %v618_v7  ;;  %v652_v34 = vpack.c.bf16 %v635_v18, %v634_v43  ;;  %v4176_v60 = vunpack.c.l.bf16 %v4165_v58  ;;  %v4179_v21 = vunpack.c.h.bf16 %v4165_v58 }
  0xf7   : > { %v1126_v45 = vmul.f32 %v3994_v37, %v1093_v11  ;;  %v648_v39 = vpack.c.bf16 %v629_v50, %v628_v33  ;;  %v640_v11 = vpack.c.bf16 %v617_v14, %v616_v13  ;;  %v4865_v43 = vpack.c.bf16 %v4017_v15, %v4013_v5 }
  0xf9   : > { %700 = vrot.lane.b32.xlu0 %v654_v20, %s3578_s7  ;;  %682 = vrot.lane.b32.xlu1 %v645_v63, %s3578_s7  ;;  %v3380_v20 = vpop.permute.xlu0 %3379  ;;  %v642_v63 = vpack.c.bf16 %v620_v26, %v619_v42  ;;  %v4193_v42 = vld [vmem:[#allocation2 + $0x24] sm:$0xff] }
  0xfa   : > { %694 = vrot.lane.b32.xlu2 %v651_v47, %s3578_s7  ;;  %v1142_v47 = vpack.c.bf16 %v1126_v45, %v1126_v45  ;;  %v4151_v62 = vunpack.i.h.bf16 %v3380_v20  ;;  %v4153_v29 = vunpack.i.l.bf16 %v3380_v20  ;;  %v4866_v45 = vpack.c.bf16 %v4028_v16, %v4021_v36 }
  0xfb   : > { %v4215_v5 = vunpack.c.h.bf16 %v4193_v42 }
  0xfc   : > { %v4183_v28 = vsel %vm1583_vm7, %v4153_v29, %v4151_v62  ;;  %v4187_v0 = vmul.f32 %v4153_v29, %v4176_v60 }
  0xfd   : > { %v4223_v36 = vmul.f32 %v4183_v28, %v4215_v5 }
 0x101   : > { %680 = vrot.lane.b32.xlu0 %v644_v52, %s3578_s7  ;;  %678 = vrot.lane.b32.xlu1 %v643_v6, %s3578_s7  ;;  %v1483_v54 = vpop.permute.xlu0 %1482  ;;  %v4128_v52 = vpop.permute.xlu2 %1486  ;;  %v4142_v6 = vunpack.i.h.bf16 %v3375_v46 }
 0x102   : > { %674 = vrot.lane.b32.xlu2 %v641_v49, %s3578_s7  ;;  %v1502_v32 = vrot.slane %v1483_v54, 4  ;;  %v4144_v49 = vunpack.i.l.bf16 %v3375_v46 }
 0x104   : > { %v1519_v51 = vsel %vm518_vm0, %v1502_v32, %v1503_v3  ;;  %v4157_v1 = vsel %vm1284_vm6, %v4144_v49, %v4142_v6  ;;  %v4169_v61 = vmul.f32 %v4144_v49, %v4070_v59  ;;  %v1087_v3 = vunpack.c.l.bf16 %v1065_v2 }
 0x105   : > { %v1520_v7 = vsel %vm1507_vm5, %v1483_v54, %v1519_v51  ;;  %v4173_v10 = vmul.f32 %v4157_v1, %v4073_v4  ;;  %v1541_v54 = vld [vmem:[#allocation2 + $0xc] sm:$0xff]  ;;  %v4867_v51 = vpack.c.bf16 %v4040_v24, %v4032_v17 }
 0x106   : > { %1537 = vst [vmem:[#allocation3 + $0x1f0] sm:$0xff] %v1520_v7  ;;  %v1558_v50 = vunpack.c.l.bf16 %v1541_v54  ;;  %v1559_v7 = vunpack.c.h.bf16 %v1541_v54 }
 0x108   : > { %v4239_v13 = vmul.f32 %v4153_v29, %v1558_v50  ;;  %v4244_v17 = vmul.f32 %v4183_v28, %v1559_v7 }
 0x109   : > { %676 = vrot.lane.b32.xlu0 %v642_v63, %s3578_s7  ;;  %696 = vrot.lane.b32.xlu1 %v652_v34, %s3578_s7  ;;  %v4211_v63 = vunpack.c.l.bf16 %v4193_v42 }
 0x10a   : > { %1189 = vrot.lane.b32.xlu2 %v1142_v47, %s3579_s13  ;;  %v1061_v47 = vld [vmem:[#allocation2 + $0x2c] sm:$0xf]  ;;  %4869 = vst [vmem:[#allocation15_spill] sm:$0xff] %v4239_v13 }
 0x10b   : > { %v4219_v15 = vmul.f32 %v4153_v29, %v4211_v63  ;;  %v1081_v16 = vunpack.c.l.bf16 %v1061_v47  ;;  %4870 = vst [vmem:[#allocation16_spill] sm:$0xff] %v4244_v17  ;;  %v1437_v47 = vld [vmem:[#allocation2 + $0x44] sm:$0xf] }
 0x10d   : > { %v1114_v14 = vmul.f32 %v3994_v37, %v1081_v16 }
 0x111   : > { %1488 = vrot.lane.b32.xlu0 %v1441_v27, %s3576_s25  ;;  %692 = vrot.lane.b32.xlu1 %v650_v19, %s3578_s7  ;;  %v1063_v19 = vld [vmem:[#allocation2 + $0x38] sm:$0xf]  ;;  %v4868_v27 = vpack.c.bf16 %v4052_v41, %v4044_v25  ;;  %v1134_v25 = vpack.c.bf16 %v1114_v14, %v1114_v14 }
 0x112   : > { %688 = vrot.lane.b32.xlu2 %v648_v39, %s3578_s7  ;;  %v1084_v20 = vunpack.c.l.bf16 %v1063_v19 }
 0x114   : > { %v1117_v34 = vmul.f32 %v3994_v37, %v1084_v20 }
 0x116   : > { %v1136_v32 = vpack.c.bf16 %v1117_v34, %v1117_v34 }
 0x119   : > { %1179 = vrot.lane.b32.xlu0 %v1137_v48, %s3579_s13  ;;  %672 = vrot.lane.b32.xlu1 %v640_v11, %s3578_s7  ;;  %v4191_v48 = vmul.f32 %v4183_v28, %v4179_v21  ;;  %v1120_v11 = vmul.f32 %v3994_v37, %v1087_v3 }
 0x11a   : > { %684 = vrot.lane.b32.xlu2 %v646_v35, %s3578_s7  ;;  %v4163_v55 = vpop.permute.xlu2 %890  ;;  %v1435_v35 = vld [vmem:[#allocation2 + $0x38] sm:$0xf]  ;;  %s3494_s7 = scalar_lea.hbm %s4848_s4, 256 }
 0x11b   : > { %v1138_v41 = vpack.c.bf16 %v1120_v11, %v1120_v11  ;;  %p3496_p11 = scmp.lt.s32.totalorder %s3494_s7, %s3490_s23 }
 0x11d   : > { %p3497_p12 = por %p3496_p11, %p3495_p10 }
 0x11f   : > { %p3498_p13 = pnand %p3497_p12, %p3493_p9 }
 0x121   : > { %1476 = vrot.lane.b32.xlu0 %v1435_v35, %s3576_s25  ;;  %1187 = vrot.lane.b32.xlu1 %v4865_v43, %s3579_s13  ;;  %v1055_v43 = vld [vmem:[#allocation2 + $0x8] sm:$0xf] }
 0x122   : > { %1183 = vrot.lane.b32.xlu2 %v4866_v45, %s3579_s13  ;;  %v4208_v46 = vpop.permute.xlu2 %878  ;;  %v1059_v45 = vld [vmem:[#allocation2 + $0x20] sm:$0xf]  ;;  %v1072_v34 = vunpack.c.l.bf16 %v1055_v43 }
 0x123   : > { %v1078_v2 = vunpack.c.l.bf16 %v1059_v45 }
 0x129   : > { %1167 = vrot.lane.b32.xlu0 %v4867_v51, %s3579_s13  ;;  %1175 = vrot.lane.b32.xlu1 %v4868_v27, %s3579_s13  ;;  %v1111_v51 = vmul.f32 %v3994_v37, %v1078_v2 }
 0x12a   : > { %1177 = vrot.lane.b32.xlu2 %v1136_v32, %s3579_s13  ;;  %v4236_v39 = vpop.permute.xlu2 %870 }
 0x12b   : > { %v1132_v14 = vpack.c.bf16 %v1111_v51, %v1111_v51  ;;  %v4278_v51 = vld [vmem:[#allocation2 + $0x18] sm:$0xff] }
 0x12c   : > { %v1263_v33 = vunpack.c.h.bf16 %v4278_v51 }
 0x131   : > { %1173 = vrot.lane.b32.xlu0 %v1134_v25, %s3579_s13  ;;  %1181 = vrot.lane.b32.xlu1 %v1138_v41, %s3579_s13 }
 0x132   : > { %1474 = vrot.lane.b32.xlu2 %v3793_v12, %s3576_s25  ;;  %v887_v19 = vpop.permute.xlu0 %886  ;;  %v4252_v35 = vpop.permute.xlu2 %866  ;;  %v1105_v12 = vmul.f32 %v3994_v37, %v1072_v34 }
 0x133   : > { %v883_v20 = vpop.permute.xlu1 %882  ;;  %v905_v3 = vrot.slane %v887_v19, 4 }
 0x134   : > { %v903_v41 = vrot.slane %v883_v20, 4 }
 0x139   : > { %1470 = vrot.lane.b32.xlu0 %v3781_v8, %s3576_s25  ;;  %1478 = vrot.lane.b32.xlu1 %v3815_v40, %s3576_s25  ;;  %v1128_v8 = vpack.c.bf16 %v1105_v12, %v1105_v12  ;;  %v4871_v40 = vpack.c.bf16 %v4067_v56, %v4063_v53 }
 0x13a   : > { %1480 = vrot.lane.b32.xlu2 %v1437_v47, %s3576_s25  ;;  %v863_v54 = vpop.permute.xlu0 %862  ;;  %v885_v16 = vpop.permute.xlu2 %884  ;;  %v907_v47 = vrot.slane %v4163_v55, 4 }
 0x13b   : > { %v875_v32 = vpop.permute.xlu1 %874  ;;  %v904_v50 = vrot.slane %v885_v16, 4  ;;  %v893_v19 = vrot.slane %v863_v54, 4  ;;  %v1431_v54 = vld [vmem:[#allocation2 + $0x20] sm:$0xf] }
 0x13d   : > { %v921_v27 = vsel %vm518_vm0, %v904_v50, %v905_v3  ;;  %v4272_v3 = vld [vmem:[#allocation2] sm:$0xff] }
 0x13e   : > { %v922_v7 = vsel %vm909_vm8, %v885_v16, %v921_v27  ;;  %v4281_v55 = vunpack.c.l.bf16 %v4272_v3  ;;  %v4284_v27 = vunpack.c.h.bf16 %v4272_v3 }
 0x13f   : > { %939 = vst [vmem:[#allocation3 + $0xf0] sm:$0xff] %v922_v7 }
 0x141   : > { %1161 = vrot.lane.b32.xlu0 %v1128_v8, %s3579_s13  ;;  %1169 = vrot.lane.b32.xlu1 %v1132_v14, %s3579_s13  ;;  %v899_v8 = vrot.slane %v875_v32, 4 }
 0x142   : > { %1171 = vrot.lane.b32.xlu2 %v4871_v40, %s3579_s13  ;;  %v881_v11 = vpop.permute.xlu0 %880  ;;  %v861_v25 = vpop.permute.xlu2 %860 }
 0x143   : > { %v889_v43 = vpop.permute.xlu1 %888  ;;  %v902_v45 = vrot.slane %v881_v11, 4  ;;  %v892_v34 = vrot.slane %v861_v25, 4 }
 0x144   : > { %v906_v2 = vrot.slane %v889_v43, 4 }
 0x145   : > { %v919_v16 = vsel %vm518_vm0, %v902_v45, %v903_v41  ;;  %v908_v12 = vsel %vm518_vm0, %v892_v34, %v893_v19  ;;  %v1103_v19 = vmul.f32 %v3985_v30, %v4281_v55  ;;  %v1057_v34 = vld [vmem:[#allocation2 + $0x14] sm:$0xf] }
 0x146   : > { %v923_v50 = vsel %vm518_vm0, %v906_v2, %v907_v47  ;;  %v920_v53 = vsel %vm909_vm8, %v881_v11, %v919_v16  ;;  %v910_v56 = vsel %vm909_vm8, %v861_v25, %v908_v12  ;;  %v901_v11 = vrot.slane %v4208_v46, 4  ;;  %v1429_v2 = vld [vmem:[#allocation2 + $0x14] sm:$0xf]  ;;  %v1433_v16 = vld [vmem:[#allocation2 + $0x2c] sm:$0xf] }
 0x147   : > { %v924_v20 = vsel %vm909_vm8, %v889_v43, %v923_v50  ;;  %938 = vst [vmem:[#allocation3 + $0xe8] sm:$0xff] %v920_v53  ;;  %v1104_v43 = vmul.f32 %v3999_v57, %v4284_v27  ;;  %v2970_v12 = vld [vmem:[#allocation3 + $0xf0] sm:$0xf] }
 0x148   : > { %940 = vst [vmem:[#allocation3 + $0xf8] sm:$0xff] %v924_v20 }
 0x149   : > { %933 = vst [vmem:[#allocation3 + $0xc0] sm:$0xff] %v910_v56  ;;  %1458 = vrot.lane.b32.xlu0 %v4272_v3, %s3576_s25  ;;  %1466 = vrot.lane.b32.xlu1 %v4278_v51, %s3576_s25  ;;  %v1127_v53 = vpack.c.bf16 %v1104_v43, %v1103_v19  ;;  %v1075_v56 = vunpack.c.l.bf16 %v1057_v34  ;;  %v955_v34 = vld [vmem:[#allocation2 + $0x54] sm:$0xff] }
 0x14a   : > { %1468 = vrot.lane.b32.xlu2 %v1431_v54, %s3576_s25  ;;  %v873_v7 = vpop.permute.xlu0 %872  ;;  %v897_v54 = vrot.slane %v4236_v39, 4 }
 0x14b   : > { %v877_v14 = vpop.permute.xlu1 %876  ;;  %v898_v40 = vrot.slane %v873_v7, 4 }
 0x14c   : > { %v900_v25 = vrot.slane %v877_v14, 4  ;;  %v4292_v41 = vpop.permute.xlu2 %698 }
 0x14d   : > { %v915_v45 = vsel %vm518_vm0, %v898_v40, %v899_v8  ;;  %v1253_v40 = vld [vmem:[#allocation2 + $0x50] sm:$0xf] }
 0x14e   : > { %v917_v47 = vsel %vm518_vm0, %v900_v25, %v901_v11  ;;  %v916_v32 = vsel %vm909_vm8, %v873_v7, %v915_v45  ;;  %v3198_v43 = vld [vmem:[#allocation3 + $0xe4] sm:$0xf0]  ;;  %v1276_v45 = vunpack.c.l.bf16 %v1253_v40 }
 0x14f   : > { %v918_v46 = vsel %vm909_vm8, %v877_v14, %v917_v47  ;;  %936 = vst [vmem:[#allocation3 + $0xd8] sm:$0xff] %v916_v32  ;;  %v3200_v50 = vld [vmem:[#allocation3 + $0xf4] sm:$0xf0]  ;;  %v1108_v14 = vmul.f32 %v3994_v37, %v1075_v56 }
 0x150   : > { %937 = vst [vmem:[#allocation3 + $0xe0] sm:$0xff] %v918_v46  ;;  %v2971_v30 = vor.u32 %v3200_v50, %v2970_v12  ;;  %v2946_v40 = vld [vmem:[#allocation3 + $0xc0] sm:$0xf] }
 0x151   : > { %1464 = vrot.lane.b32.xlu0 %v1429_v2, %s3576_s25  ;;  %1472 = vrot.lane.b32.xlu1 %v1433_v16, %s3576_s25  ;;  %v1130_v47 = vpack.c.bf16 %v1108_v14, %v1108_v14  ;;  %v1309_v2 = vmul.f32 %v4142_v6, %v1276_v45  ;;  %v895_v16 = vrot.slane %v4252_v35, 4  ;;  %v954_v14 = vld [vmem:[#allocation2 + $0x50] sm:$0xf] }
 0x152   : > { %1159 = vrot.lane.b32.xlu2 %v1127_v53, %s3579_s13  ;;  %2323 = vmatpush.bf16.msra.mxu1 %v2971_v30  ;;  %v4305_v57 = vpop.permute.xlu0 %690  ;;  %v1427_v53 = vld [vmem:[#allocation2 + $0x8] sm:$0xf] }
 0x153   : > { %3250 = vmatpush.bf16.msra.mxu3 %v2971_v30  ;;  %v869_v20 = vpop.permute.xlu1 %868  ;;  %v1326_v31 = vpack.c.bf16 %v1309_v2, %v1309_v2 }
 0x154   : > { %v896_v7 = vrot.slane %v869_v20, 4  ;;  %v4308_v8 = vpop.permute.xlu2 %694 }
 0x156   : > { %v913_v11 = vsel %vm518_vm0, %v896_v7, %v897_v54  ;;  %v3196_v30 = vld [vmem:[#allocation3 + $0xd4] sm:$0xf0]  ;;  %v953_v7 = vld [vmem:[#allocation2 + $0x48] sm:$0xff] }
 0x157   : > { %v914_v25 = vsel %vm909_vm8, %v869_v20, %v913_v11  ;;  %v2962_v19 = vld [vmem:[#allocation3 + $0xe0] sm:$0xf]  ;;  %v4337_v45 = vunpack.c.h.bf16 %v953_v7 }
 0x158   : > { %935 = vst [vmem:[#allocation3 + $0xd0] sm:$0xff] %v914_v25  ;;  %v2963_v32 = vor.u32 %v3198_v43, %v2962_v19  ;;  %v4335_v25 = vunpack.c.l.bf16 %v953_v7  ;;  %v949_v19 = vld [vmem:[#allocation2 + $0x30] sm:$0xff] }
 0x159   : > { %1001 = vrot.lane.b32.xlu0 %v955_v34, %s3580_s27  ;;  %1163 = vrot.lane.b32.xlu1 %v1129_v44, %s3579_s13 }
 0x15a   : > { %1165 = vrot.lane.b32.xlu2 %v1130_v47, %s3579_s13  ;;  %2324 = vmatpush.bf16.msra.mxu1 %v2963_v32  ;;  %v4319_v37 = vpop.permute.xlu0 %686 }
 0x15b   : > { %3251 = vmatpush.bf16.msra.mxu3 %v2963_v32  ;;  %v865_v39 = vpop.permute.xlu1 %864  ;;  %v1307_v32 = vmul.f32 %v4144_v49, %v4335_v25 }
 0x15c   : > { %v894_v46 = vrot.slane %v865_v39, 4  ;;  %v4323_v12 = vpop.permute.xlu2 %674 }
 0x15e   : > { %v911_v50 = vsel %vm518_vm0, %v894_v46, %v895_v16 }
 0x15f   : > { %v912_v9 = vsel %vm909_vm8, %v865_v39, %v911_v50  ;;  %v2954_v44 = vld [vmem:[#allocation3 + $0xd0] sm:$0xf]  ;;  %v1255_v39 = vld [vmem:[#allocation2 + $0x5c] sm:$0xf]  ;;  %v1308_v50 = vmul.f32 %v4157_v1, %v4337_v45 }
 0x160   : > { %934 = vst [vmem:[#allocation3 + $0xc8] sm:$0xff] %v912_v9  ;;  %v2955_v56 = vor.u32 %v3196_v30, %v2954_v44  ;;  %v952_v30 = vld [vmem:[#allocation2 + $0x44] sm:$0xf] }
 0x161   : > { %1371 = vrot.lane.b32.xlu0 %v1326_v31, %s3581_s10  ;;  %1460 = vrot.lane.b32.xlu1 %v1427_v53, %s3576_s25  ;;  %v713_v53 = vrot.slane %v4305_v57, 4  ;;  %v4347_v31 = vunpack.c.l.bf16 %v955_v34  ;;  %v419_v57 = vmul.f32 %v4337_v45, %v3801_v23  ;;  %v1325_v24 = vpack.c.bf16 %v1308_v50, %v1307_v32 }
 0x162   : > { %1462 = vrot.lane.b32.xlu2 %v4059_v38, %s3576_s25  ;;  %2325 = vmatpush.bf16.msra.mxu1 %v2955_v56  ;;  %v1304_v32 = vmul.f32 %v4144_v49, %v4176_v60  ;;  %v1305_v50 = vmul.f32 %v4157_v1, %v4179_v21 }
 0x163   : > { %3252 = vmatpush.bf16.msra.mxu3 %v2955_v56  ;;  %v4331_v35 = vpop.permute.xlu0 %1185  ;;  %v703_v20 = vpop.permute.xlu1 %702  ;;  %v956_v56 = vld [vmem:[#allocation2 + $0x5c] sm:$0xf] }
 0x164   : > { %v4333_v54 = vpop.permute.xlu2 %1189  ;;  %v719_v2 = vrot.slane %v703_v20, 4 }
 0x167   : > { %v3194_v11 = vld [vmem:[#allocation3 + $0xc4] sm:$0xf0] }
 0x168   : > { %v2947_v43 = vor.u32 %v3194_v11, %v2946_v40  ;;  %v418_v11 = vmul.f32 %v4335_v25, %v3799_v22 }
 0x169   : > { %989 = vrot.lane.b32.xlu0 %v949_v19, %s3580_s27  ;;  %997 = vrot.lane.b32.xlu1 %v953_v7, %s3580_s27  ;;  %v4350_v7 = vunpack.c.h.bf16 %v955_v34 }
 0x16a   : > { %999 = vrot.lane.b32.xlu2 %v954_v14, %s3580_s27  ;;  %2326 = vmatpush.bf16.msra.mxu1 %v2947_v43  ;;  %v1279_v14 = vunpack.c.l.bf16 %v1255_v39  ;;  %v4367_v39 = vunpack.c.l.bf16 %v949_v19 }
 0x16b   : > { %3253 = vmatpush.bf16.msra.mxu3 %v2947_v43  ;;  %v701_v38 = vpop.permute.xlu0 %700  ;;  %v683_v47 = vpop.permute.xlu1 %682  ;;  %v421_v34 = vmul.f32 %v4350_v7, %v3801_v23 }
 0x16c   : > { %v718_v16 = vrot.slane %v701_v38, 4  ;;  %v689_v46 = vpop.permute.xlu2 %688 }
 0x16d   : > { %v712_v9 = vrot.slane %v689_v46, 4 }
 0x16e   : > { %v735_v44 = vsel %vm518_vm0, %v718_v16, %v719_v2  ;;  %v420_v2 = vmul.f32 %v4347_v31, %v3799_v22  ;;  %v4369_v16 = vunpack.c.h.bf16 %v949_v19  ;;  %v414_v19 = vmul.f32 %v4367_v39, %v3799_v22 }
 0x16f   : > { %v736_v20 = vsel %vm721_vm9, %v701_v38, %v735_v44  ;;  %v729_v40 = vsel %vm518_vm0, %v712_v9, %v713_v53  ;;  %v1310_v38 = vmul.f32 %v4144_v49, %v4347_v31  ;;  %v1311_v53 = vmul.f32 %v4157_v1, %v4350_v7 }
 0x170   : > { %752 = vst [vmem:[#allocation3 + $0xb8] sm:$0xff] %v736_v20  ;;  %v730_v43 = vsel %vm721_vm9, %v689_v46, %v729_v40  ;;  %v428_v46 = vpack.c.bf16 %v419_v57, %v418_v11  ;;  %v429_v9 = vpack.c.bf16 %v421_v34, %v420_v2  ;;  %v417_v20 = vmul.f32 %v4179_v21, %v3801_v23 }
 0x171   : > { %749 = vst [vmem:[#allocation3 + $0xa0] sm:$0xff] %v730_v43  ;;  %995 = vrot.lane.b32.xlu0 %v952_v30, %s3580_s27  ;;  %1003 = vrot.lane.b32.xlu1 %v956_v56, %s3580_s27  ;;  %v415_v56 = vmul.f32 %v4369_v16, %v3801_v23  ;;  %v709_v40 = vrot.slane %v683_v47, 4  ;;  %v1312_v43 = vmul.f32 %v4142_v6, %v1279_v14  ;;  %v1262_v2 = vunpack.c.l.bf16 %v4278_v51 }
 0x172   : > { %1369 = vrot.lane.b32.xlu2 %v1325_v24, %s3581_s10  ;;  %436 = vst [vmem:[#allocation3 + $0x30] sm:$0xff] %v428_v46  ;;  %v416_v24 = vmul.f32 %v4176_v60, %v3799_v22  ;;  %v711_v34 = vrot.slane %v4319_v37, 4  ;;  %v1323_v60 = vpack.c.bf16 %v1305_v50, %v1304_v32  ;;  %v1327_v13 = vpack.c.bf16 %v1311_v53, %v1310_v38 }
 0x173   : > { %v681_v44 = vpop.permute.xlu0 %680  ;;  %v679_v30 = vpop.permute.xlu1 %678  ;;  %437 = vst [vmem:[#allocation3 + $0x38] sm:$0xff] %v429_v9  ;;  %v426_v26 = vpack.c.bf16 %v415_v56, %v414_v19  ;;  %v410_v14 = vmul.f32 %v1262_v2, %v3799_v22  ;;  %v411_v37 = vmul.f32 %v1263_v33, %v3801_v23  ;;  %v1328_v19 = vpack.c.bf16 %v1312_v43, %v1312_v43 }
 0x174   : > { %v708_v11 = vrot.slane %v681_v44, 4  ;;  %v685_v57 = vpop.permute.xlu2 %684  ;;  %v427_v17 = vpack.c.bf16 %v417_v20, %v416_v24  ;;  %v412_v38 = vmul.f32 %v3799_v22, %v4211_v63  ;;  %v717_v32 = vrot.slane %v4292_v41, 4  ;;  %v1249_v24 = vld [vmem:[#allocation2 + $0x38] sm:$0xf] }
 0x175   : > { %v710_v46 = vrot.slane %v685_v57, 4  ;;  %434 = vst [vmem:[#allocation3 + $0x20] sm:$0xff] %v426_v26  ;;  %v424_v26 = vpack.c.bf16 %v411_v37, %v410_v14  ;;  %v409_v41 = vmul.f32 %v4073_v4, %v3801_v23 }
 0x176   : > { %v725_v18 = vsel %vm518_vm0, %v708_v11, %v709_v40  ;;  %435 = vst [vmem:[#allocation3 + $0x28] sm:$0xff] %v427_v17  ;;  %v406_v40 = vmul.f32 %v4281_v55, %v3799_v22  ;;  %v407_v11 = vmul.f32 %v4284_v27, %v3801_v23 }
 0x177   : > { %v726_v21 = vsel %vm721_vm9, %v681_v44, %v725_v18  ;;  %v727_v47 = vsel %vm518_vm0, %v710_v46, %v711_v34  ;;  %v413_v18 = vmul.f32 %v3801_v23, %v4215_v5  ;;  %432 = vst [vmem:[#allocation3 + $0x10] sm:$0xff] %v424_v26  ;;  %v1504_v26 = vrot.slane %v4128_v52, 4 }
 0x178   : > { %747 = vst [vmem:[#allocation3 + $0x90] sm:$0xff] %v726_v21  ;;  %v728_v9 = vsel %vm721_vm9, %v685_v57, %v727_v47  ;;  %v707_v57 = vrot.slane %v679_v30, 4  ;;  %v422_v47 = vpack.c.bf16 %v407_v11, %v406_v40  ;;  %v1301_v40 = vmul.f32 %v4144_v49, %v4367_v39 }
 0x179   : > { %748 = vst [vmem:[#allocation3 + $0x98] sm:$0xff] %v728_v9  ;;  %1365 = vrot.lane.b32.xlu0 %v1323_v60, %s3581_s10  ;;  %1373 = vrot.lane.b32.xlu1 %v1327_v13, %s3581_s10  ;;  %v2874_v50 = vld [vmem:[#allocation3 + $0x30] sm:$0xf]  ;;  %v425_v53 = vpack.c.bf16 %v413_v18, %v412_v38  ;;  %v408_v13 = vmul.f32 %v4070_v59, %v3799_v22  ;;  %v1204_v60 = vrot.slane %v4331_v35, 4  ;;  %v946_v9 = vld [vmem:[#allocation2 + $0x20] sm:$0xf]  ;;  %v1270_v59 = vunpack.c.l.bf16 %v1249_v24 }
 0x17a   : > { %1375 = vrot.lane.b32.xlu2 %v1328_v19, %s3581_s10  ;;  %v3176_v20 = vld [vmem:[#allocation3 + $0x34] sm:$0xf0]  ;;  %430 = vst [vmem:[#allocation3] sm:$0xff] %v422_v47  ;;  %v1302_v11 = vmul.f32 %v4157_v1, %v4369_v16 }
 0x17b   : > { %v677_v44 = vpop.permute.xlu0 %676  ;;  %v697_v56 = vpop.permute.xlu1 %696  ;;  %v2875_v46 = vor.u32 %v3176_v20, %v2874_v50  ;;  %433 = vst [vmem:[#allocation3 + $0x18] sm:$0xff] %v425_v53  ;;  %v950_v22 = vld [vmem:[#allocation2 + $0x38] sm:$0xf]  ;;  %v423_v35 = vpack.c.bf16 %v409_v41, %v408_v13  ;;  %v1247_v50 = vld [vmem:[#allocation2 + $0x2c] sm:$0xf]  ;;  %v1296_v20 = vmul.f32 %v4157_v1, %v1263_v33 }
 0x17c   : > { %v706_v17 = vrot.slane %v677_v44, 4  ;;  %v716_v43 = vrot.slane %v697_v56, 4  ;;  %v1184_v34 = vpop.permute.xlu2 %1183  ;;  %v2866_v19 = vld [vmem:[#allocation3 + $0x20] sm:$0xf]  ;;  %v1251_v13 = vld [vmem:[#allocation2 + $0x44] sm:$0xf] }
 0x17d   : > { %v1203_v21 = vrot.slane %v1184_v34, 4  ;;  %3246 = vmatpush.bf16.msra.mxu2 %v2875_v46  ;;  %2298 = vmatpush.bf16.msra.mxu0 %v2875_v46  ;;  %v3174_v18 = vld [vmem:[#allocation3 + $0x24] sm:$0xf0]  ;;  %431 = vst [vmem:[#allocation3 + $0x8] sm:$0xff] %v423_v35 }
 0x17e   : > { %v723_v14 = vsel %vm518_vm0, %v706_v17, %v707_v57  ;;  %v733_v37 = vsel %vm518_vm0, %v716_v43, %v717_v32  ;;  %v1295_v32 = vmul.f32 %v4144_v49, %v1262_v2  ;;  %v2867_v53 = vor.u32 %v3174_v18, %v2866_v19 }
 0x17f   : > { %v724_v23 = vsel %vm721_vm9, %v677_v44, %v723_v14  ;;  %v734_v4 = vsel %vm721_vm9, %v697_v56, %v733_v37  ;;  %v1220_v30 = vsel %vm518_vm0, %v1203_v21, %v1204_v60  ;;  %v2858_v44 = vld [vmem:[#allocation3 + $0x10] sm:$0xf]  ;;  %v715_v2 = vrot.slane %v4308_v8, 4 }
 0x180   : > { %746 = vst [vmem:[#allocation3 + $0x88] sm:$0xff] %v724_v23  ;;  %v1221_v38 = vsel %vm1208_vm10, %v1184_v34, %v1220_v30  ;;  %v1267_v60 = vunpack.c.l.bf16 %v1247_v50  ;;  %v1273_v21 = vunpack.c.l.bf16 %v1251_v13  ;;  %v1317_v37 = vpack.c.bf16 %v1296_v20, %v1295_v32  ;;  %v2930_v20 = vld [vmem:[#allocation3 + $0xa0] sm:$0xf]  ;;  %v3188_v13 = vld [vmem:[#allocation3 + $0x94] sm:$0xf0] }
 0x181   : > { %751 = vst [vmem:[#allocation3 + $0xb0] sm:$0xff] %v734_v4  ;;  %983 = vrot.lane.b32.xlu0 %v946_v9, %s3580_s27  ;;  %991 = vrot.lane.b32.xlu1 %v950_v22, %s3580_s27  ;;  %v1321_v8 = vpack.c.bf16 %v1302_v11, %v1301_v40  ;;  %v3192_v9 = vld [vmem:[#allocation3 + $0xb4] sm:$0xf0]  ;;  %v2850_v23 = vld [vmem:[#allocation3] sm:$0xf] }
 0x182   : > { %1238 = vst [vmem:[#allocation3 + $0x170] sm:$0xff] %v1221_v38  ;;  %993 = vrot.lane.b32.xlu2 %v4165_v58, %s3580_s27  ;;  %v1303_v58 = vmul.f32 %v4142_v6, %v1270_v59  ;;  %v3172_v41 = vld [vmem:[#allocation3 + $0x14] sm:$0xf0]  ;;  %3247 = vmatpush.bf16.msra.mxu2 %v2867_v53  ;;  %v1300_v35 = vmul.f32 %v4142_v6, %v1267_v60 }
 0x183   : > { %v1489_v56 = vpop.permute.xlu0 %1488  ;;  %v693_v24 = vpop.permute.xlu1 %692  ;;  %v2859_v34 = vor.u32 %v3172_v41, %v2858_v44  ;;  %2299 = vmatpush.bf16.msra.mxu0 %v2867_v53  ;;  %v1306_v38 = vmul.f32 %v4142_v6, %v1273_v21  ;;  %v1245_v21 = vld [vmem:[#allocation2 + $0x20] sm:$0xf] }
 0x184   : > { %v1505_v57 = vrot.slane %v1489_v56, 4  ;;  %v714_v17 = vrot.slane %v693_v24, 4  ;;  %v4440_v43 = vpop.permute.xlu2 %1177  ;;  %v1322_v22 = vpack.c.bf16 %v1303_v58, %v1303_v58  ;;  %v1320_v56 = vpack.c.bf16 %v1300_v35, %v1300_v35 }
 0x186   : > { %v1521_v33 = vsel %vm518_vm0, %v1504_v26, %v1505_v57  ;;  %v731_v46 = vsel %vm518_vm0, %v714_v17, %v715_v2  ;;  %3248 = vmatpush.bf16.msra.mxu2 %v2859_v34  ;;  %v705_v26 = vrot.slane %v4323_v12, 4  ;;  %v2922_v12 = vld [vmem:[#allocation3 + $0x90] sm:$0xf]  ;;  %v1609_v57 = vmul.f32 %v4153_v29, %v4347_v31 }
 0x187   : > { %v1522_v47 = vsel %vm1507_vm5, %v4128_v52, %v1521_v33  ;;  %v732_v14 = vsel %vm721_vm9, %v693_v24, %v731_v46  ;;  %2300 = vmatpush.bf16.msra.mxu0 %v2859_v34  ;;  %v3170_v52 = vld [vmem:[#allocation3 + $0x4] sm:$0xf0]  ;;  %v1324_v24 = vpack.c.bf16 %v1306_v38, %v1306_v38  ;;  %v1610_v17 = vmul.f32 %v4183_v28, %v4350_v7 }
 0x188   : > { %1538 = vst [vmem:[#allocation3 + $0x1f8] sm:$0xff] %v1522_v47  ;;  %v2938_v59 = vld [vmem:[#allocation3 + $0xb0] sm:$0xf]  ;;  %v2851_v18 = vor.u32 %v3170_v52, %v2850_v23  ;;  %v1206_v34 = vrot.slane %v4333_v54, 4  ;;  %v3183_v47 = vld [vmem:[#allocation3 + $0x74] sm:$0xf] }
 0x189   : > { %750 = vst [vmem:[#allocation3 + $0xa8] sm:$0xff] %v732_v14  ;;  %1353 = vrot.lane.b32.xlu0 %v1317_v37, %s3581_s10  ;;  %1361 = vrot.lane.b32.xlu1 %v1321_v8, %s3581_s10  ;;  %v2939_v4 = vor.u32 %v3192_v9, %v2938_v59  ;;  %v948_v8 = vld [vmem:[#allocation2 + $0x2c] sm:$0xf]  ;;  %v2908_v9 = vld [vmem:[#allocation3 + $0x78] sm:$0xf0]  ;;  %v1626_v54 = vpack.c.bf16 %v1610_v17, %v1609_v57 }
 0x18a   : > { %1363 = vrot.lane.b32.xlu2 %v1322_v22, %s3581_s10  ;;  %3249 = vmatpush.bf16.msra.mxu2 %v2851_v18  ;;  %v3186_v59 = vld [vmem:[#allocation3 + $0x84] sm:$0xf0]  ;;  %v2911_v38 = vor.u32 %v3183_v47, %v2908_v9  ;;  %v3034_v17 = vld [vmem:[#allocation3 + $0x170] sm:$0xf]  ;;  %v1290_v47 = vmul.f32 %v4157_v1, %v4284_v27  ;;  %v1607_v9 = vmul.f32 %v4183_v28, %v4337_v45 }
 0x18b   : > { %2327 = vmatpush.bf16.msra.mxu1 %v2939_v4  ;;  %3254 = vmatpush.bf16.msra.mxu3 %v2939_v4  ;;  %v4450_v30 = vpop.permute.xlu0 %1179  ;;  %v673_v19 = vpop.permute.xlu1 %672  ;;  %v1264_v4 = vunpack.c.l.bf16 %v1245_v21  ;;  %v2884_v21 = vld [vmem:[#allocation3 + $0x48] sm:$0xf0] }
 0x18c   : > { %v704_v32 = vrot.slane %v673_v19, 4  ;;  %v1475_v50 = vpop.permute.xlu2 %1474  ;;  %2301 = vmatpush.bf16.msra.mxu0 %v2851_v18 }
 0x18d   : > { %v1498_v58 = vrot.slane %v1475_v50, 4 }
 0x18e   : > { %v720_v53 = vsel %vm518_vm0, %v704_v32, %v705_v26  ;;  %v3181_v32 = vld [vmem:[#allocation3 + $0x64] sm:$0xf] }
 0x18f   : > { %v722_v44 = vsel %vm721_vm9, %v673_v19, %v720_v53  ;;  %v3232_v23 = vld [vmem:[#allocation3 + $0x1f4] sm:$0xf0]  ;;  %v3098_v19 = vld [vmem:[#allocation3 + $0x1f0] sm:$0xf]  ;;  %v1297_v53 = vmul.f32 %v4142_v6, %v1264_v4 }
 0x190   : > { %745 = vst [vmem:[#allocation3 + $0x80] sm:$0xff] %v722_v44  ;;  %v3190_v40 = vld [vmem:[#allocation3 + $0xa4] sm:$0xf0]  ;;  %v3099_v35 = vor.u32 %v3232_v23, %v3098_v19  ;;  %v1200_v44 = vrot.slane %v4440_v43, 4 }
 0x191   : > { %1359 = vrot.lane.b32.xlu0 %v1320_v56, %s3581_s10  ;;  %1367 = vrot.lane.b32.xlu1 %v1324_v24, %s3581_s10  ;;  %v2931_v11 = vor.u32 %v3190_v40, %v2930_v20  ;;  %v1298_v24 = vmul.f32 %v4144_v49, %v4211_v63  ;;  %v1299_v20 = vmul.f32 %v4157_v1, %v4215_v5  ;;  %v1552_v40 = vld [vmem:[#allocation2 + $0x50] sm:$0xf]  ;;  %v3179_v5 = vld [vmem:[#allocation3 + $0x54] sm:$0xf]  ;;  %v1554_v1 = vld [vmem:[#allocation2 + $0x5c] sm:$0xf] }
 0x192   : > { %981 = vrot.lane.b32.xlu2 %v4278_v51, %s3580_s27  ;;  %v2923_v51 = vor.u32 %v3188_v13, %v2922_v12  ;;  %v942_v12 = vld [vmem:[#allocation2 + $0x8] sm:$0xf]  ;;  %v1575_v43 = vunpack.c.l.bf16 %v1552_v40 }
 0x193   : > { %2328 = vmatpush.bf16.msra.mxu1 %v2931_v11  ;;  %3255 = vmatpush.bf16.msra.mxu3 %v2931_v11  ;;  %v1477_v41 = vpop.permute.xlu0 %1476  ;;  %v1188_v2 = vpop.permute.xlu1 %1187  ;;  %v1319_v57 = vpack.c.bf16 %v1299_v20, %v1298_v24 }
 0x194   : > { %v1499_v33 = vrot.slane %v1477_v41, 4  ;;  %v1205_v46 = vrot.slane %v1188_v2, 4  ;;  %v4466_v60 = vpop.permute.xlu2 %1480  ;;  %v1318_v41 = vpack.c.bf16 %v1297_v53, %v1297_v53 }
 0x196   : > { %v1515_v14 = vsel %vm518_vm0, %v1498_v58, %v1499_v33  ;;  %v1222_v37 = vsel %vm518_vm0, %v1205_v46, %v1206_v34  ;;  %v3177_v46 = vld [vmem:[#allocation3 + $0x44] sm:$0xf] }
 0x197   : > { %v1516_v31 = vsel %vm1507_vm5, %v1475_v50, %v1515_v14  ;;  %v1223_v22 = vsel %vm1208_vm10, %v1188_v2, %v1222_v37  ;;  %2329 = vmatpush.bf16.msra.mxu1 %v2923_v51  ;;  %3256 = vmatpush.bf16.msra.mxu3 %v2923_v51  ;;  %v2914_v7 = vld [vmem:[#allocation3 + $0x80] sm:$0xf]  ;;  %v2900_v50 = vld [vmem:[#allocation3 + $0x68] sm:$0xf0]  ;;  %v2892_v2 = vld [vmem:[#allocation3 + $0x58] sm:$0xf0]  ;;  %v1289_v51 = vmul.f32 %v4144_v49, %v4281_v55 }
 0x198   : > { %1535 = vst [vmem:[#allocation3 + $0x1e0] sm:$0xff] %v1516_v31  ;;  %v2915_v52 = vor.u32 %v3186_v59, %v2914_v7  ;;  %v2903_v58 = vor.u32 %v3181_v32, %v2900_v50  ;;  %v2895_v33 = vor.u32 %v3179_v5, %v2892_v2  ;;  %v1608_v31 = vmul.f32 %v4151_v62, %v1575_v43  ;;  %v1241_v2 = vld [vmem:[#allocation2 + $0x8] sm:$0xf]  ;;  %v1544_v5 = vld [vmem:[#allocation2 + $0x20] sm:$0xf] }
 0x199   : > { %1239 = vst [vmem:[#allocation3 + $0x178] sm:$0xff] %v1223_v22  ;;  %1672 = vrot.lane.b32.xlu0 %v1626_v54, %s3582_s12  ;;  %985 = vrot.lane.b32.xlu1 %v4193_v42, %s3580_s27  ;;  %v1243_v22 = vld [vmem:[#allocation2 + $0x14] sm:$0xf]  ;;  %v1201_v54 = vrot.slane %v4450_v30, 4  ;;  %v2887_v27 = vor.u32 %v3177_v46, %v2884_v21  ;;  %v1313_v4 = vpack.c.bf16 %v1290_v47, %v1289_v51  ;;  %v1501_v32 = vrot.slane %v4466_v60, 4 }
 0x19a   : > { %987 = vrot.lane.b32.xlu2 %v948_v8, %s3580_s27  ;;  %v1606_v8 = vmul.f32 %v4153_v29, %v4335_v25  ;;  %v1258_v21 = vunpack.c.l.bf16 %v1241_v2  ;;  %v944_v47 = vld [vmem:[#allocation2 + $0x14] sm:$0xf] }
 0x19b   : > { %2330 = vmatpush.bf16.msra.mxu1 %v2915_v52  ;;  %3257 = vmatpush.bf16.msra.mxu3 %v2915_v52  ;;  %v4476_v18 = vpop.permute.xlu0 %1167  ;;  %v1176_v26 = vpop.permute.xlu1 %1175  ;;  %v1261_v52 = vunpack.c.l.bf16 %v1243_v22  ;;  %v3383_v22 = vld [vmem:[#allocation2 + $0xc] sm:$0xff] }
 0x19c   : > { %v1199_v56 = vrot.slane %v1176_v26, 4  ;;  %v1172_v42 = vpop.permute.xlu2 %1171  ;;  %v1195_v43 = vrot.slane %v4476_v18, 4 }
 0x19d   : > { %v1197_v7 = vrot.slane %v1172_v42, 4 }
 0x19e   : > { %v1216_v11 = vsel %vm518_vm0, %v1199_v56, %v1200_v44  ;;  %v1294_v44 = vmul.f32 %v4142_v6, %v1261_v52 }
 0x19f   : > { %2381 = vmatpush.bf16.msrb.mxu3 %v3099_v35  ;;  %2439 = vmatpush.bf16.msrb.mxu1 %v2911_v38  ;;  %v1217_v13 = vsel %vm1208_vm10, %v1176_v26, %v1216_v11  ;;  %v1624_v35 = vpack.c.bf16 %v1607_v9, %v1606_v8  ;;  %v1578_v38 = vunpack.c.l.bf16 %v1554_v1  ;;  %v1625_v26 = vpack.c.bf16 %v1608_v31, %v1608_v31 }
 0x1a0   : > { %1236 = vst [vmem:[#allocation3 + $0x160] sm:$0xff] %v1217_v13  ;;  %v3216_v34 = vld [vmem:[#allocation3 + $0x174] sm:$0xf0]  ;;  %v1316_v40 = vpack.c.bf16 %v1294_v44, %v1294_v44  ;;  %v1563_v8 = vunpack.c.l.bf16 %v1544_v5  ;;  %v4872_v31 = vpack.c.bf16 %v4191_v48, %v4187_v0  ;;  %v1601_v44 = vmul.f32 %v4183_v28, %v4369_v16 }
 0x1a1   : > { %975 = vrot.lane.b32.xlu0 %v942_v12, %s3580_s27  ;;  %1355 = vrot.lane.b32.xlu1 %v1318_v41, %s3581_s10  ;;  %v3035_v63 = vor.u32 %v3216_v34, %v3034_v17  ;;  %v1548_v0 = vld [vmem:[#allocation2 + $0x38] sm:$0xf] }
 0x1a2   : > { %1357 = vrot.lane.b32.xlu2 %v1319_v57, %s3581_s10 }
 0x1a3   : > { %2440 = vmatpush.bf16.msrb.mxu1 %v2903_v58  ;;  %2352 = vmatpush.bf16.msrb.mxu2 %v3035_v63  ;;  %v1174_v14 = vpop.permute.xlu0 %1173  ;;  %v1182_v37 = vpop.permute.xlu1 %1181 }
 0x1a4   : > { %v1198_v59 = vrot.slane %v1174_v14, 4  ;;  %v1202_v49 = vrot.slane %v1182_v37, 4  ;;  %v4499_v55 = vpop.permute.xlu2 %1468  ;;  %v3090_v14 = vld [vmem:[#allocation3 + $0x1e0] sm:$0xf] }
 0x1a6   : > { %v1214_v23 = vsel %vm518_vm0, %v1197_v7, %v1198_v59  ;;  %v1218_v25 = vsel %vm518_vm0, %v1201_v54, %v1202_v49  ;;  %v1495_v54 = vrot.slane %v4499_v55, 4  ;;  %v1596_v49 = vmul.f32 %v4151_v62, %v1563_v8 }
 0x1a7   : > { %2441 = vmatpush.bf16.msrb.mxu1 %v2895_v33  ;;  %v1215_v45 = vsel %vm1208_vm10, %v1172_v42, %v1214_v23  ;;  %v1219_v19 = vsel %vm1208_vm10, %v4450_v30, %v1218_v25  ;;  %v1611_v30 = vmul.f32 %v4151_v62, %v1578_v38  ;;  %v3026_v58 = vld [vmem:[#allocation3 + $0x160] sm:$0xf] }
 0x1a8   : > { %1235 = vst [vmem:[#allocation3 + $0x158] sm:$0xff] %v1215_v45  ;;  %v1539_v23 = vld [vmem:[#allocation2] sm:$0xff]  ;;  %v1617_v55 = vpack.c.bf16 %v1596_v49, %v1596_v49 }
 0x1a9   : > { %1237 = vst [vmem:[#allocation3 + $0x168] sm:$0xff] %v1219_v19  ;;  %1345 = vrot.lane.b32.xlu0 %v1313_v4, %s3581_s10  ;;  %1668 = vrot.lane.b32.xlu1 %v1624_v35, %s3582_s12  ;;  %v1627_v11 = vpack.c.bf16 %v1611_v30, %v1611_v30  ;;  %v1555_v52 = vunpack.c.l.bf16 %v1539_v23  ;;  %v1556_v45 = vunpack.c.h.bf16 %v1539_v23  ;;  %v1569_v35 = vunpack.c.l.bf16 %v1548_v0 }
 0x1aa   : > { %1670 = vrot.lane.b32.xlu2 %v1625_v26, %s3582_s12 }
 0x1ab   : > { %2442 = vmatpush.bf16.msrb.mxu1 %v2887_v27  ;;  %v4510_v50 = vpop.permute.xlu0 %1470  ;;  %v1479_v53 = vpop.permute.xlu1 %1478 }
 0x1ac   : > { %v1500_v56 = vrot.slane %v1479_v53, 4  ;;  %v1160_v42 = vpop.permute.xlu2 %1159 }
 0x1ad   : > { %v1191_v57 = vrot.slane %v1160_v42, 4 }
 0x1ae   : > { %v1517_v24 = vsel %vm518_vm0, %v1500_v56, %v1501_v32  ;;  %v4873_v32 = vpack.c.bf16 %v4173_v10, %v4169_v61  ;;  %v1602_v10 = vmul.f32 %v4151_v62, %v1569_v35 }
 0x1af   : > { %v1518_v20 = vsel %vm1507_vm5, %v1479_v53, %v1517_v24  ;;  %v1600_v53 = vmul.f32 %v4153_v29, %v4367_v39  ;;  %v1589_v24 = vmul.f32 %v4183_v28, %v1556_v45  ;;  %v1550_v39 = vld [vmem:[#allocation2 + $0x44] sm:$0xf] }
 0x1b0   : > { %1536 = vst [vmem:[#allocation3 + $0x1e8] sm:$0xff] %v1518_v20  ;;  %v3214_v60 = vld [vmem:[#allocation3 + $0x164] sm:$0xf0]  ;;  %v1542_v20 = vld [vmem:[#allocation2 + $0x14] sm:$0xf] }
 0x1b1   : > { %1351 = vrot.lane.b32.xlu0 %v1316_v40, %s3581_s10  ;;  %1674 = vrot.lane.b32.xlu1 %v1627_v11, %s3582_s12  ;;  %v3027_v12 = vor.u32 %v3214_v60, %v3026_v58  ;;  %v1496_v40 = vrot.slane %v4510_v50, 4  ;;  %v1543_v60 = vld [vmem:[#allocation2 + $0x18] sm:$0xff] }
 0x1b2   : > { %973 = vrot.lane.b32.xlu2 %v4272_v3, %s3580_s27  ;;  %v1561_v5 = vunpack.c.l.bf16 %v1543_v60 }
 0x1b3   : > { %2353 = vmatpush.bf16.msrb.mxu2 %v3027_v12  ;;  %v1162_v13 = vpop.permute.xlu0 %1161  ;;  %v1170_v41 = vpop.permute.xlu1 %1169 }
 0x1b4   : > { %v1192_v17 = vrot.slane %v1162_v13, 4  ;;  %v1196_v34 = vrot.slane %v1170_v41, 4  ;;  %v4521_v63 = vpop.permute.xlu2 %1165  ;;  %v1620_v13 = vpack.c.bf16 %v1601_v44, %v1600_v53  ;;  %v1560_v41 = vunpack.c.l.bf16 %v1542_v20 }
 0x1b6   : > { %v1207_v33 = vsel %vm518_vm0, %v1191_v57, %v1192_v17  ;;  %v1212_v46 = vsel %vm518_vm0, %v1195_v43, %v1196_v34  ;;  %v1572_v17 = vunpack.c.l.bf16 %v1550_v39  ;;  %v1621_v34 = vpack.c.bf16 %v1602_v10, %v1602_v10 }
 0x1b7   : > { %v1209_v51 = vsel %vm1208_vm10, %v1160_v42, %v1207_v33  ;;  %v1213_v3 = vsel %vm1208_vm10, %v4476_v18, %v1212_v46  ;;  %v3230_v37 = vld [vmem:[#allocation3 + $0x1e4] sm:$0xf0]  ;;  %v1291_v18 = vmul.f32 %v4142_v6, %v1258_v21  ;;  %v3212_v6 = vld [vmem:[#allocation3 + $0x154] sm:$0xf0]  ;;  %v1588_v42 = vmul.f32 %v4153_v29, %v1555_v52 }
 0x1b8   : > { %1232 = vst [vmem:[#allocation3 + $0x140] sm:$0xff] %v1209_v51  ;;  %v3091_v9 = vor.u32 %v3230_v37, %v3090_v14  ;;  %v1562_v33 = vunpack.c.h.bf16 %v1543_v60  ;;  %v1593_v51 = vmul.f32 %v4151_v62, %v1560_v41  ;;  %v1594_v37 = vmul.f32 %v4153_v29, %v1561_v5  ;;  %v1540_v52 = vld [vmem:[#allocation2 + $0x8] sm:$0xf] }
 0x1b9   : > { %1234 = vst [vmem:[#allocation3 + $0x150] sm:$0xff] %v1213_v3  ;;  %1664 = vrot.lane.b32.xlu0 %v4872_v31, %s3582_s12  ;;  %977 = vrot.lane.b32.xlu1 %v3383_v22, %s3580_s27  ;;  %v1314_v25 = vpack.c.bf16 %v1291_v18, %v1291_v18  ;;  %v1612_v57 = vpack.c.bf16 %v1589_v24, %v1588_v42  ;;  %v1194_v3 = vrot.slane %v4521_v63, 4  ;;  %v4875_v60 = vld [vmem:[#allocation16_spill] sm:$0xff] }
 0x1ba   : > { %979 = vrot.lane.b32.xlu2 %v944_v47, %s3580_s27  ;;  %2382 = vmatpush.bf16.msrb.mxu3 %v3091_v9  ;;  %v1595_v8 = vmul.f32 %v4183_v28, %v1562_v33  ;;  %v1546_v9 = vld [vmem:[#allocation2 + $0x2c] sm:$0xf] }
 0x1bb   : > { %v4536_v7 = vpop.permute.xlu0 %1458  ;;  %v1467_v59 = vpop.permute.xlu1 %1466 }
 0x1bc   : > { %v1494_v1 = vrot.slane %v1467_v59, 4  ;;  %v1463_v27 = vpop.permute.xlu2 %1462  ;;  %v1616_v49 = vpack.c.bf16 %v1595_v8, %v1594_v37  ;;  %v1490_v0 = vrot.slane %v4536_v7, 4 }
 0x1bd   : > { %v1492_v26 = vrot.slane %v1463_v27, 4 }
 0x1be   : > { %v1511_v48 = vsel %vm518_vm0, %v1494_v1, %v1495_v54  ;;  %v1615_v54 = vpack.c.bf16 %v1593_v51, %v1593_v51 }
 0x1bf   : > { %v1512_v4 = vsel %vm1507_vm5, %v1467_v59, %v1511_v48  ;;  %v1566_v59 = vunpack.c.l.bf16 %v1546_v9 }
 0x1c0   : > { %1533 = vst [vmem:[#allocation3 + $0x1d0] sm:$0xff] %v1512_v4  ;;  %v3018_v19 = vld [vmem:[#allocation3 + $0x150] sm:$0xf] }
 0x1c1   : > { %1654 = vrot.lane.b32.xlu0 %v1617_v55, %s3582_s12  ;;  %1347 = vrot.lane.b32.xlu1 %v1314_v25, %s3581_s10  ;;  %v3019_v38 = vor.u32 %v3212_v6, %v3018_v19  ;;  %v1599_v23 = vmul.f32 %v4151_v62, %v1566_v59 }
 0x1c2   : > { %1349 = vrot.lane.b32.xlu2 %v4873_v32, %s3581_s10  ;;  %v1557_v32 = vunpack.c.l.bf16 %v1540_v52 }
 0x1c3   : > { %2354 = vmatpush.bf16.msrb.mxu2 %v3019_v38  ;;  %v1465_v30 = vpop.permute.xlu0 %1464  ;;  %v1473_v56 = vpop.permute.xlu1 %1472  ;;  %v3010_v38 = vld [vmem:[#allocation3 + $0x140] sm:$0xf]  ;;  %v1619_v53 = vpack.c.bf16 %v1599_v23, %v1599_v23 }
 0x1c4   : > { %v1493_v11 = vrot.slane %v1465_v30, 4  ;;  %v1497_v58 = vrot.slane %v1473_v56, 4  ;;  %v4554_v61 = vpop.permute.xlu2 %999  ;;  %v4874_v30 = vpack.c.bf16 %v4223_v36, %v4219_v15 }
 0x1c5   : > { %v1018_v56 = vrot.slane %v4554_v61, 4 }
 0x1c6   : > { %v1509_v16 = vsel %vm518_vm0, %v1492_v26, %v1493_v11  ;;  %v1513_v12 = vsel %vm518_vm0, %v1496_v40, %v1497_v58 }
 0x1c7   : > { %v1510_v2 = vsel %vm1507_vm5, %v1463_v27, %v1509_v16  ;;  %v1514_v43 = vsel %vm1507_vm5, %v4510_v50, %v1513_v12  ;;  %v1605_v50 = vmul.f32 %v4151_v62, %v1572_v17  ;;  %v3082_v1 = vld [vmem:[#allocation3 + $0x1d0] sm:$0xf]  ;;  %v4876_v16 = vld [vmem:[#allocation15_spill] sm:$0xff] }
 0x1c8   : > { %1532 = vst [vmem:[#allocation3 + $0x1c8] sm:$0xff] %v1510_v2  ;;  %v4877_v12 = vpack.c.bf16 %v4875_v60, %v4876_v16  ;;  %v3175_v16 = vld [vmem:[#allocation3 + $0x34] sm:$0xf] }
 0x1c9   : > { %1534 = vst [vmem:[#allocation3 + $0x1d8] sm:$0xff] %v1514_v43  ;;  %1644 = vrot.lane.b32.xlu0 %v1612_v57, %s3582_s12  ;;  %1660 = vrot.lane.b32.xlu1 %v1620_v13, %s3582_s12  ;;  %v1623_v18 = vpack.c.bf16 %v1605_v50, %v1605_v50 }
 0x1ca   : > { %1662 = vrot.lane.b32.xlu2 %v1621_v34, %s3582_s12 }
 0x1cb   : > { %v4565_v46 = vpop.permute.xlu0 %1001  ;;  %v1164_v21 = vpop.permute.xlu1 %1163 }
 0x1cc   : > { %v1193_v47 = vrot.slane %v1164_v21, 4  ;;  %v1370_v14 = vpop.permute.xlu2 %1369  ;;  %v1019_v41 = vrot.slane %v4565_v46, 4 }
 0x1cd   : > { %v1389_v48 = vrot.slane %v1370_v14, 4 }
 0x1ce   : > { %v1210_v31 = vsel %vm518_vm0, %v1193_v47, %v1194_v3 }
 0x1cf   : > { %v1211_v22 = vsel %vm1208_vm10, %v1164_v21, %v1210_v31  ;;  %v3226_v36 = vld [vmem:[#allocation3 + $0x1c4] sm:$0xf0] }
 0x1d0   : > { %1233 = vst [vmem:[#allocation3 + $0x148] sm:$0xff] %v1211_v22  ;;  %v3228_v27 = vld [vmem:[#allocation3 + $0x1d4] sm:$0xf0] }
 0x1d1   : > { %1650 = vrot.lane.b32.xlu0 %v1615_v54, %s3582_s12  ;;  %1666 = vrot.lane.b32.xlu1 %v1623_v18, %s3582_s12  ;;  %v3083_v63 = vor.u32 %v3228_v27, %v3082_v1 }
 0x1d2   : > { %1652 = vrot.lane.b32.xlu2 %v1616_v49, %s3582_s12 }
 0x1d3   : > { %2383 = vmatpush.bf16.msrb.mxu3 %v3083_v63  ;;  %v1372_v29 = vpop.permute.xlu0 %1371  ;;  %v1461_v28 = vpop.permute.xlu1 %1460 }
 0x1d4   : > { %v1390_v25 = vrot.slane %v1372_v29, 4  ;;  %v1491_v4 = vrot.slane %v1461_v28, 4  ;;  %v1376_v55 = vpop.permute.xlu2 %1375 }
 0x1d5   : > { %v1392_v50 = vrot.slane %v1376_v55, 4 }
 0x1d6   : > { %v1406_v45 = vsel %vm518_vm0, %v1389_v48, %v1390_v25  ;;  %v1506_v19 = vsel %vm518_vm0, %v1490_v0, %v1491_v4 }
 0x1d7   : > { %v1407_v6 = vsel %vm1394_vm11, %v1370_v14, %v1406_v45  ;;  %v1508_v35 = vsel %vm1507_vm5, %v4536_v7, %v1506_v19  ;;  %v3210_v26 = vld [vmem:[#allocation3 + $0x144] sm:$0xf0]  ;;  %v1590_v7 = vmul.f32 %v4151_v62, %v1557_v32 }
 0x1d8   : > { %1424 = vst [vmem:[#allocation3 + $0x1b0] sm:$0xff] %v1407_v6  ;;  %v3011_v44 = vor.u32 %v3210_v26, %v3010_v38  ;;  %v2810_v26 = vld [vmem:[#allocation4 + $0x50] sm:$0xf] }
 0x1d9   : > { %1531 = vst [vmem:[#allocation3 + $0x1c0] sm:$0xff] %v1508_v35  ;;  %1656 = vrot.lane.b32.xlu1 %v4874_v30, %s3582_s12  ;;  %v1613_v10 = vpack.c.bf16 %v1590_v7, %v1590_v7 }
 0x1da   : > { %1658 = vrot.lane.b32.xlu2 %v1619_v53, %s3582_s12  ;;  %2355 = vmatpush.bf16.msrb.mxu2 %v3011_v44  ;;  %v3161_v53 = vld [vmem:[#allocation4 + $0x60] sm:$0xf0] }
 0x1db   : > { %v990_v42 = vpop.permute.xlu0 %989  ;;  %v998_v24 = vpop.permute.xlu1 %997  ;;  %v4614_v44 = vor.u32 %v3161_v53, %v2810_v26 }
 0x1dc   : > { %v1017_v20 = vrot.slane %v998_v24, 4  ;;  %v994_v40 = vpop.permute.xlu2 %993 }
 0x1dd   : > { %v1015_v39 = vrot.slane %v994_v40, 4  ;;  %2312 = vmatmul.bf16.vlgmr.msra.gmra.mxu2 %v4614_v44 }
 0x1de   : > { %v1034_v11 = vsel %vm518_vm0, %v1017_v20, %v1018_v56 }
 0x1df   : > { %v1035_v58 = vsel %vm1022_vm12, %v998_v24, %v1034_v11  ;;  %v3066_v23 = vld [vmem:[#allocation3 + $0x1b0] sm:$0xf] }
 0x1e0   : > { %1052 = vst [vmem:[#allocation3 + $0x130] sm:$0xff] %v1035_v58  ;;  %v3074_v15 = vld [vmem:[#allocation3 + $0x1c0] sm:$0xf] }
 0x1e1   : > { %1646 = vrot.lane.b32.xlu1 %v1613_v10, %s3582_s12  ;;  %v3075_v61 = vor.u32 %v3226_v36, %v3074_v15 }
 0x1e2   : > { %1648 = vrot.lane.b32.xlu2 %v4877_v12, %s3582_s12  ;;  %v2876_v12 = vld [vmem:[#allocation3 + $0x38] sm:$0xf0] }
 0x1e3   : > { %2384 = vmatpush.bf16.msrb.mxu3 %v3075_v61  ;;  %v996_v62 = vpop.permute.xlu0 %995  ;;  %v1004_v13 = vpop.permute.xlu1 %1003  ;;  %v3159_v61 = vld [vmem:[#allocation4 + $0x54] sm:$0xf] }
 0x1e4   : > { %v1016_v2 = vrot.slane %v996_v62, 4  ;;  %v1020_v43 = vrot.slane %v1004_v13, 4  ;;  %v1364_v57 = vpop.permute.xlu2 %1363  ;;  %v3173_v62 = vld [vmem:[#allocation3 + $0x24] sm:$0xf] }
 0x1e5   : > { %v1386_v55 = vrot.slane %v1364_v57, 4 }
 0x1e6   : > { %v1032_v17 = vsel %vm518_vm0, %v1015_v39, %v1016_v2  ;;  %v1036_v34 = vsel %vm518_vm0, %v1019_v41, %v1020_v43  ;;  %v2812_v39 = vld [vmem:[#allocation4 + $0x64] sm:$0xf0]  ;;  %v2879_v2 = vor.u32 %v3175_v16, %v2876_v12  ;;  %v2868_v43 = vld [vmem:[#allocation3 + $0x28] sm:$0xf0] }
 0x1e7   : > { %v1033_v5 = vsel %vm1022_vm12, %v994_v40, %v1032_v17  ;;  %v1037_v33 = vsel %vm1022_vm12, %v4565_v46, %v1036_v34  ;;  %v3002_v8 = vld [vmem:[#allocation3 + $0x130] sm:$0xf]  ;;  %v1013_v46 = vrot.slane %v990_v42, 4  ;;  %v4623_v60 = vor.u32 %v3159_v61, %v2812_v39 }
 0x1e8   : > { %1051 = vst [vmem:[#allocation3 + $0x128] sm:$0xff] %v1033_v5  ;;  %2443 = vmatpush.bf16.msrb.mxu1 %v2879_v2  ;;  %v2871_v34 = vor.u32 %v3173_v62, %v2868_v43 }
 0x1e9   : > { %1053 = vst [vmem:[#allocation3 + $0x138] sm:$0xff] %v1037_v33  ;;  %2341 = vmatmul.bf16.vlgmr.msra.gmra.mxu3 %v4623_v60 }
 0x1eb   : > { %v1366_v21 = vpop.permute.xlu0 %1365  ;;  %v1374_v51 = vpop.permute.xlu1 %1373 }
 0x1ec   : > { %v1391_v3 = vrot.slane %v1374_v51, 4  ;;  %v982_v47 = vpop.permute.xlu2 %981  ;;  %2444 = vmatpush.bf16.msrb.mxu1 %v2871_v34 }
 0x1ed   : > { %v1009_v22 = vrot.slane %v982_v47, 4 }
 0x1ee   : > { %v1408_v14 = vsel %vm518_vm0, %v1391_v3, %v1392_v50  ;;  %v2830_v3 = vld [vmem:[#allocation4 + $0x78] sm:$0xf] }
 0x1ef   : > { %v1409_v37 = vsel %vm1394_vm11, %v1374_v51, %v1408_v14  ;;  %v3206_v35 = vld [vmem:[#allocation3 + $0x124] sm:$0xf0]  ;;  %v3166_v14 = vld [vmem:[#allocation4 + $0x88] sm:$0xf0] }
 0x1f0   : > { %1425 = vst [vmem:[#allocation3 + $0x1b8] sm:$0xff] %v1409_v37  ;;  %v3208_v9 = vld [vmem:[#allocation3 + $0x134] sm:$0xf0]  ;;  %v3171_v37 = vld [vmem:[#allocation3 + $0x14] sm:$0xf] }
 0x1f1   : > { %v3003_v31 = vor.u32 %v3208_v9, %v3002_v8  ;;  %v2860_v8 = vld [vmem:[#allocation3 + $0x18] sm:$0xf0]  ;;  %v4630_v9 = vor.u32 %v3166_v14, %v2830_v3 }
 0x1f3   : > { %2356 = vmatpush.bf16.msrb.mxu2 %v3003_v31  ;;  %v984_v54 = vpop.permute.xlu0 %983  ;;  %v992_v18 = vpop.permute.xlu1 %991  ;;  %v2863_v31 = vor.u32 %v3171_v37, %v2860_v8 }
 0x1f4   : > { %v1010_v59 = vrot.slane %v984_v54, 4  ;;  %v1014_v49 = vrot.slane %v992_v18, 4  ;;  %v988_v1 = vpop.permute.xlu2 %987  ;;  %v2852_v54 = vld [vmem:[#allocation3 + $0x8] sm:$0xf0]  ;;  %v3149_v18 = vld [vmem:[#allocation4 + $0x4] sm:$0xf]  ;;  %2317 = vmatmul.bf16.gmra.mxu2 %v4630_v9 }
 0x1f5   : > { %v1012_v36 = vrot.slane %v988_v1, 4  ;;  %2445 = vmatpush.bf16.msrb.mxu1 %v2863_v31  ;;  %v3156_v31 = vld [vmem:[#allocation4 + $0x38] sm:$0xf0] }
 0x1f6   : > { %v1026_v27 = vsel %vm518_vm0, %v1009_v22, %v1010_v59  ;;  %v1030_v63 = vsel %vm518_vm0, %v1013_v46, %v1014_v49  ;;  %v3169_v22 = vld [vmem:[#allocation3 + $0x4] sm:$0xf]  ;;  %v2772_v49 = vld [vmem:[#allocation4 + $0x14] sm:$0xf0] }
 0x1f7   : > { %v1027_v29 = vsel %vm1022_vm12, %v982_v47, %v1026_v27  ;;  %v1031_v28 = vsel %vm1022_vm12, %v990_v42, %v1030_v63  ;;  %v3224_v0 = vld [vmem:[#allocation3 + $0x1b4] sm:$0xf0]  ;;  %v1387_v42 = vrot.slane %v1366_v21, 4 }
 0x1f8   : > { %1048 = vst [vmem:[#allocation3 + $0x110] sm:$0xff] %v1027_v29  ;;  %v3067_v48 = vor.u32 %v3224_v0, %v3066_v23  ;;  %v2855_v23 = vor.u32 %v3169_v22, %v2852_v54  ;;  %v3154_v22 = vld [vmem:[#allocation4 + $0x2c] sm:$0xf]  ;;  %v2792_v54 = vld [vmem:[#allocation4 + $0x3c] sm:$0xf0] }
 0x1f9   : > { %1050 = vst [vmem:[#allocation3 + $0x120] sm:$0xff] %v1031_v28  ;;  %v4634_v28 = vor.u32 %v3149_v18, %v2772_v49  ;;  %v4667_v49 = vor.u32 %v3154_v22, %v2792_v54 }
 0x1fa   : > { %2385 = vmatpush.bf16.msrb.mxu3 %v3067_v48  ;;  %2446 = vmatpush.bf16.msrb.mxu1 %v2855_v23 }
 0x1fb   : > { %v4610_v25 = vpop.permute.xlu0 %1353  ;;  %v1362_v4 = vpop.permute.xlu1 %1361  ;;  %2331 = vmatmul.bf16.vlgmr.msra.gmra.mxu1 %v4634_v28 }
 0x1fc   : > { %v1385_v52 = vrot.slane %v1362_v4, 4  ;;  %v1358_v45 = vpop.permute.xlu2 %1357  ;;  %v1381_v1 = vrot.slane %v4610_v25, 4 }
 0x1fd   : > { %v1383_v24 = vrot.slane %v1358_v45, 4 }
 0x1fe   : > { %v1402_v19 = vsel %vm518_vm0, %v1385_v52, %v1386_v55 }
 0x1ff   : > { %v1403_v6 = vsel %vm1394_vm11, %v1362_v4, %v1402_v19  ;;  %v2986_v52 = vld [vmem:[#allocation3 + $0x110] sm:$0xf] }
 0x200   : > { %1422 = vst [vmem:[#allocation3 + $0x1a0] sm:$0xff] %v1403_v6  ;;  %v2994_v38 = vld [vmem:[#allocation3 + $0x120] sm:$0xf]  ;;  %v3164_v6 = vld [vmem:[#allocation4 + $0x7c] sm:$0xf] }
 0x201   : > { %v2995_v32 = vor.u32 %v3206_v35, %v2994_v38  ;;  %v2832_v35 = vld [vmem:[#allocation4 + $0x8c] sm:$0xf0] }
 0x202   : > { %v4642_v38 = vor.u32 %v3164_v6, %v2832_v35 }
 0x203   : > { %2357 = vmatpush.bf16.msrb.mxu2 %v2995_v32  ;;  %v1360_v30 = vpop.permute.xlu0 %1359  ;;  %v1368_v56 = vpop.permute.xlu1 %1367 }
 0x204   : > { %v1384_v7 = vrot.slane %v1360_v30, 4  ;;  %v1388_v20 = vrot.slane %v1368_v56, 4  ;;  %v4616_v40 = vpop.permute.xlu2 %1670  ;;  %2346 = vmatmul.bf16.gmra.mxu3 %v4642_v38 }
 0x205   : > { %v1689_v53 = vrot.slane %v4616_v40, 4 }
 0x206   : > { %v1400_v11 = vsel %vm518_vm0, %v1383_v24, %v1384_v7  ;;  %v1404_v58 = vsel %vm518_vm0, %v1387_v42, %v1388_v20 }
 0x207   : > { %v1401_v10 = vsel %vm1394_vm11, %v1358_v45, %v1400_v11  ;;  %v1405_v15 = vsel %vm1394_vm11, %v1366_v21, %v1404_v58  ;;  %v3058_v21 = vld [vmem:[#allocation3 + $0x1a0] sm:$0xf]  ;;  %v3151_v58 = vld [vmem:[#allocation4 + $0x10] sm:$0xf0] }
 0x208   : > { %1421 = vst [vmem:[#allocation3 + $0x198] sm:$0xff] %v1401_v10  ;;  %v2770_v11 = vld [vmem:[#allocation4] sm:$0xf] }
 0x209   : > { %1423 = vst [vmem:[#allocation3 + $0x1a8] sm:$0xff] %v1405_v15  ;;  %v4650_v10 = vor.u32 %v3151_v58, %v2770_v11 }
 0x20b   : > { %v4625_v13 = vpop.permute.xlu0 %1672  ;;  %v986_v41 = vpop.permute.xlu1 %985  ;;  %2302 = vmatmul.bf16.vlgmr.msra.gmra.mxu0 %v4650_v10  ;;  %2336 = vmatmul.bf16.gmra.mxu1 %v4667_v49 }
 0x20c   : > { %v1011_v57 = vrot.slane %v986_v41, 4  ;;  %v974_v17 = vpop.permute.xlu2 %973 }
 0x20d   : > { %v1005_v51 = vrot.slane %v974_v17, 4 }
 0x20e   : > { %v1028_v5 = vsel %vm518_vm0, %v1011_v57, %v1012_v36  ;;  %v1690_v36 = vrot.slane %v4625_v13, 4 }
 0x20f   : > { %v1029_v33 = vsel %vm1022_vm12, %v986_v41, %v1028_v5  ;;  %v3220_v7 = vld [vmem:[#allocation3 + $0x194] sm:$0xf0] }
 0x210   : > { %1049 = vst [vmem:[#allocation3 + $0x118] sm:$0xff] %v1029_v33  ;;  %v3222_v50 = vld [vmem:[#allocation3 + $0x1a4] sm:$0xf0] }
 0x211   : > { %v3059_v47 = vor.u32 %v3222_v50, %v3058_v21 }
 0x213   : > { %2386 = vmatpush.bf16.msrb.mxu3 %v3059_v47  ;;  %v976_v46 = vpop.permute.xlu0 %975  ;;  %v1356_v59 = vpop.permute.xlu1 %1355 }
 0x214   : > { %v1006_v27 = vrot.slane %v976_v46, 4  ;;  %v1382_v63 = vrot.slane %v1356_v59, 4  ;;  %v980_v29 = vpop.permute.xlu2 %979 }
 0x215   : > { %v1008_v57 = vrot.slane %v980_v29, 4 }
 0x216   : > { %v1021_v0 = vsel %vm518_vm0, %v1005_v51, %v1006_v27  ;;  %v1398_v48 = vsel %vm518_vm0, %v1381_v1, %v1382_v63 }
 0x217   : > { %v1023_v4 = vsel %vm1022_vm12, %v974_v17, %v1021_v0  ;;  %v1399_v55 = vsel %vm1394_vm11, %v4610_v25, %v1398_v48  ;;  %v3204_v45 = vld [vmem:[#allocation3 + $0x114] sm:$0xf0]  ;;  %v2972_v48 = vld [vmem:[#allocation3 + $0xf8] sm:$0xf0] }
 0x218   : > { %1046 = vst [vmem:[#allocation3 + $0x100] sm:$0xff] %v1023_v4  ;;  %v2987_v19 = vor.u32 %v3204_v45, %v2986_v52  ;;  %v2778_v4 = vld [vmem:[#allocation4 + $0x8] sm:$0xf] }
 0x219   : > { %1420 = vst [vmem:[#allocation3 + $0x190] sm:$0xff] %v1399_v55  ;;  %v3152_v55 = vld [vmem:[#allocation4 + $0x18] sm:$0xf0] }
 0x21a   : > { %2358 = vmatpush.bf16.msrb.mxu2 %v2987_v19 }
 0x21b   : > { %v4644_v26 = vpop.permute.xlu0 %1345  ;;  %v1669_v32 = vpop.permute.xlu1 %1668  ;;  %2447 = vmatmul.bf16.vlgmr.msrb.gmra.mxu1 %v4650_v10  ;;  %v2940_v10 = vld [vmem:[#allocation3 + $0xb8] sm:$0xf0] }
 0x21c   : > { %v1688_v30 = vrot.slane %v1669_v32, 4  ;;  %v1350_v56 = vpop.permute.xlu2 %1349  ;;  %v1377_v1 = vrot.slane %v4644_v26, 4 }
 0x21d   : > { %v1379_v61 = vrot.slane %v1350_v56, 4 }
 0x21e   : > { %v1705_v25 = vsel %vm518_vm0, %v1688_v30, %v1689_v53  ;;  %v3199_v53 = vld [vmem:[#allocation3 + $0xf4] sm:$0xf] }
 0x21f   : > { %v1706_v42 = vsel %vm1693_vm13, %v1669_v32, %v1705_v25  ;;  %v2978_v6 = vld [vmem:[#allocation3 + $0x100] sm:$0xf]  ;;  %v2975_v30 = vor.u32 %v3199_v53, %v2972_v48  ;;  %v3197_v25 = vld [vmem:[#allocation3 + $0xe4] sm:$0xf]  ;;  %v3020_v48 = vld [vmem:[#allocation3 + $0x158] sm:$0xf0] }
 0x220   : > { %1723 = vst [vmem:[#allocation3 + $0x230] sm:$0xff] %v1706_v42  ;;  %v3050_v24 = vld [vmem:[#allocation3 + $0x190] sm:$0xf] }
 0x221   : > { %v3051_v20 = vor.u32 %v3220_v7, %v3050_v24 }
 0x223   : > { %2387 = vmatpush.bf16.msrb.mxu3 %v3051_v20  ;;  %v1352_v15 = vpop.permute.xlu0 %1351  ;;  %v1675_v40 = vpop.permute.xlu1 %1674  ;;  %v2964_v20 = vld [vmem:[#allocation3 + $0xe8] sm:$0xf0] }
 0x224   : > { %v1380_v39 = vrot.slane %v1352_v15, 4  ;;  %v1691_v16 = vrot.slane %v1675_v40, 4  ;;  %v4653_v12 = vpop.permute.xlu2 %1662  ;;  %v2967_v11 = vor.u32 %v3197_v25, %v2964_v20  ;;  %v3195_v15 = vld [vmem:[#allocation3 + $0xd4] sm:$0xf]  ;;  %v2956_v40 = vld [vmem:[#allocation3 + $0xd8] sm:$0xf0] }
 0x225   : > { %v1685_v7 = vrot.slane %v4653_v12, 4  ;;  %v3187_v25 = vld [vmem:[#allocation3 + $0x94] sm:$0xf]  ;;  %v3004_v20 = vld [vmem:[#allocation3 + $0x138] sm:$0xf0] }
 0x226   : > { %v1396_v62 = vsel %vm518_vm0, %v1379_v61, %v1380_v39  ;;  %v1707_v41 = vsel %vm518_vm0, %v1690_v36, %v1691_v16  ;;  %v3036_v61 = vld [vmem:[#allocation3 + $0x178] sm:$0xf0]  ;;  %v3150_v39 = vld [vmem:[#allocation4 + $0xc] sm:$0xf]  ;;  %v2780_v16 = vld [vmem:[#allocation4 + $0x1c] sm:$0xf0] }
 0x227   : > { %v1397_v2 = vsel %vm1394_vm11, %v1350_v56, %v1396_v62  ;;  %v1708_v43 = vsel %vm1693_vm13, %v4625_v13, %v1707_v41  ;;  %v3130_v50 = vld [vmem:[#allocation3 + $0x230] sm:$0xf]  ;;  %v3239_v3 = vld [vmem:[#allocation3 + $0x234] sm:$0xf]  ;;  %v2790_v13 = vld [vmem:[#allocation4 + $0x28] sm:$0xf]  ;;  %v4679_v56 = vor.u32 %v3152_v55, %v2778_v4 }
 0x228   : > { %1419 = vst [vmem:[#allocation3 + $0x188] sm:$0xff] %v1397_v2  ;;  %v4665_v59 = vor.u32 %v3156_v31, %v2790_v13  ;;  %v3213_v31 = vld [vmem:[#allocation3 + $0x164] sm:$0xf] }
 0x229   : > { %1724 = vst [vmem:[#allocation3 + $0x238] sm:$0xff] %v1708_v43  ;;  %v2959_v43 = vor.u32 %v3195_v15, %v2956_v40 }
 0x22a   : > { %2307 = vmatmul.bf16.gmra.mxu0 %v4665_v59 }
 0x22b   : > { %v4661_v17 = vpop.permute.xlu0 %1664  ;;  %v978_v34 = vpop.permute.xlu1 %977  ;;  %2452 = vmatmul.bf16.gmra.mxu1 %v4665_v59 }
 0x22c   : > { %v1007_v5 = vrot.slane %v978_v34, 4  ;;  %v1653_v33 = vpop.permute.xlu2 %1652 }
 0x22d   : > { %v1680_v27 = vrot.slane %v1653_v33, 4 }
 0x22e   : > { %v1024_v21 = vsel %vm518_vm0, %v1007_v5, %v1008_v57  ;;  %v3215_v57 = vld [vmem:[#allocation3 + $0x174] sm:$0xf]  ;;  %v4687_v5 = vor.u32 %v3150_v39, %v2780_v16 }
 0x22f   : > { %v1025_v51 = vsel %vm1022_vm12, %v978_v34, %v1024_v21  ;;  %v3218_v41 = vld [vmem:[#allocation3 + $0x184] sm:$0xf0]  ;;  %v3039_v34 = vor.u32 %v3215_v57, %v3036_v61  ;;  %v3185_v57 = vld [vmem:[#allocation3 + $0x84] sm:$0xf] }
 0x230   : > { %1047 = vst [vmem:[#allocation3 + $0x108] sm:$0xff] %v1025_v51  ;;  %v3240_v47 = vld [vmem:[#allocation3 + $0x234] sm:$0xf0]  ;;  %v3132_v14 = vld [vmem:[#allocation3 + $0x238] sm:$0xf0] }
 0x231   : > { %v3131_v37 = vor.u32 %v3240_v47, %v3130_v50  ;;  %v3135_v8 = vor.u32 %v3239_v3, %v3132_v14  ;;  %v3028_v50 = vld [vmem:[#allocation3 + $0x168] sm:$0xf0]  ;;  %v1686_v3 = vrot.slane %v4661_v17, 4 }
 0x233   : > { %2414 = vmatpush.bf16.msrb.mxu0 %v3131_v37  ;;  %2559 = vmatpush.bf16.msra.mxu1 %v3135_v8  ;;  %v1655_v18 = vpop.permute.xlu0 %1654  ;;  %v1348_v46 = vpop.permute.xlu1 %1347  ;;  %v3193_v8 = vld [vmem:[#allocation3 + $0xc4] sm:$0xf] }
 0x234   : > { %v1681_v63 = vrot.slane %v1655_v18, 4  ;;  %v1378_v29 = vrot.slane %v1348_v46, 4  ;;  %v4677_v19 = vpop.permute.xlu2 %1658  ;;  %v3031_v18 = vor.u32 %v3213_v31, %v3028_v50  ;;  %v3191_v46 = vld [vmem:[#allocation3 + $0xb4] sm:$0xf]  ;;  %v2996_v50 = vld [vmem:[#allocation3 + $0x128] sm:$0xf0] }
 0x235   : > { %v3162_v31 = vld [vmem:[#allocation4 + $0x68] sm:$0xf0] }
 0x236   : > { %v1697_v23 = vsel %vm518_vm0, %v1680_v27, %v1681_v63  ;;  %v1393_v0 = vsel %vm518_vm0, %v1377_v1, %v1378_v29  ;;  %v2798_v1 = vld [vmem:[#allocation4 + $0x30] sm:$0xf]  ;;  %v3157_v27 = vld [vmem:[#allocation4 + $0x40] sm:$0xf0] }
 0x237   : > { %v1698_v52 = vsel %vm1693_vm13, %v1653_v33, %v1697_v23  ;;  %v1395_v45 = vsel %vm1394_vm11, %v4644_v26, %v1393_v0  ;;  %v3202_v35 = vld [vmem:[#allocation3 + $0x104] sm:$0xf0]  ;;  %v2948_v33 = vld [vmem:[#allocation3 + $0xc8] sm:$0xf0]  ;;  %v3211_v23 = vld [vmem:[#allocation3 + $0x154] sm:$0xf]  ;;  %v2943_v0 = vor.u32 %v3191_v46, %v2940_v10  ;;  %v4697_v4 = vor.u32 %v3157_v27, %v2798_v1 }
 0x238   : > { %1719 = vst [vmem:[#allocation3 + $0x210] sm:$0xff] %v1698_v52  ;;  %v2979_v32 = vor.u32 %v3202_v35, %v2978_v6  ;;  %v2951_v13 = vor.u32 %v3193_v8, %v2948_v33  ;;  %v3023_v55 = vor.u32 %v3211_v23, %v3020_v48  ;;  %v2932_v52 = vld [vmem:[#allocation3 + $0xa8] sm:$0xf0]  ;;  %v1683_v35 = vrot.slane %v4677_v19, 4  ;;  %v2800_v19 = vld [vmem:[#allocation4 + $0x44] sm:$0xf0] }
 0x239   : > { %1418 = vst [vmem:[#allocation3 + $0x180] sm:$0xff] %v1395_v45  ;;  %v3012_v6 = vld [vmem:[#allocation3 + $0x148] sm:$0xf0]  ;;  %v3203_v27 = vld [vmem:[#allocation3 + $0x114] sm:$0xf] }
 0x23a   : > { %2359 = vmatpush.bf16.msrb.mxu2 %v2979_v32  ;;  %v2980_v23 = vld [vmem:[#allocation3 + $0x108] sm:$0xf0]  ;;  %v3100_v10 = vld [vmem:[#allocation3 + $0x1f8] sm:$0xf0]  ;;  %v2820_v48 = vld [vmem:[#allocation4 + $0x6c] sm:$0xf0] }
 0x23b   : > { %v4681_v42 = vpop.permute.xlu0 %1644  ;;  %v1661_v24 = vpop.permute.xlu1 %1660  ;;  %2457 = vmatmul.bf16.gmra.mxu1 %v4614_v44  ;;  %v2840_v44 = vld [vmem:[#allocation4 + $0x94] sm:$0xf0] }
 0x23c   : > { %v1684_v26 = vrot.slane %v1661_v24, 4  ;;  %v1649_v2 = vpop.permute.xlu2 %1648  ;;  %v1676_v33 = vrot.slane %v4681_v42, 4 }
 0x23d   : > { %2360 = vmatmul.bf16.vlgmr.msrb.gmra.mxu2 %v4679_v56  ;;  %v1678_v47 = vrot.slane %v1649_v2, 4 }
 0x23e   : > { %2468 = vmatpush.bf16.msra.mxu2 %v2975_v30  ;;  %v1701_v58 = vsel %vm518_vm0, %v1684_v26, %v1685_v7  ;;  %v3209_v30 = vld [vmem:[#allocation3 + $0x144] sm:$0xf]  ;;  %v2924_v26 = vld [vmem:[#allocation3 + $0x98] sm:$0xf0] }
 0x23f   : > { %v1702_v36 = vsel %vm1693_vm13, %v1661_v24, %v1701_v58  ;;  %v3015_v7 = vor.u32 %v3209_v30, %v3012_v6  ;;  %v3114_v8 = vld [vmem:[#allocation3 + $0x210] sm:$0xf]  ;;  %v3153_v6 = vld [vmem:[#allocation4 + $0x20] sm:$0xf0] }
 0x240   : > { %1721 = vst [vmem:[#allocation3 + $0x220] sm:$0xff] %v1702_v36  ;;  %v3042_v62 = vld [vmem:[#allocation3 + $0x180] sm:$0xf] }
 0x241   : > { %v3043_v12 = vor.u32 %v3218_v41, %v3042_v62  ;;  %v3207_v62 = vld [vmem:[#allocation3 + $0x134] sm:$0xf]  ;;  %v2927_v41 = vor.u32 %v3187_v25, %v2924_v26 }
 0x242   : > { %2469 = vmatpush.bf16.msra.mxu2 %v2967_v11  ;;  %v3155_v11 = vld [vmem:[#allocation4 + $0x34] sm:$0xf] }
 0x243   : > { %2388 = vmatpush.bf16.msrb.mxu3 %v3043_v12  ;;  %v1651_v21 = vpop.permute.xlu0 %1650  ;;  %v1667_v51 = vpop.permute.xlu1 %1666  ;;  %v4703_v12 = vor.u32 %v3155_v11, %v2800_v19  ;;  %v3231_v25 = vld [vmem:[#allocation3 + $0x1f4] sm:$0xf]  ;;  %v3229_v11 = vld [vmem:[#allocation3 + $0x1e4] sm:$0xf] }
 0x244   : > { %v1679_v14 = vrot.slane %v1651_v21, 4  ;;  %v1687_v37 = vrot.slane %v1667_v51, 4  ;;  %v2916_v51 = vld [vmem:[#allocation3 + $0x88] sm:$0xf0]  ;;  %v3167_v19 = vld [vmem:[#allocation4 + $0x90] sm:$0xf0] }
 0x246   : > { %2470 = vmatpush.bf16.msra.mxu2 %v2959_v43  ;;  %v1695_v22 = vsel %vm518_vm0, %v1678_v47, %v1679_v14  ;;  %v1703_v54 = vsel %vm518_vm0, %v1686_v3, %v1687_v37  ;;  %2389 = vmatmul.bf16.vlgmr.msrb.gmra.mxu3 %v4687_v5  ;;  %v2988_v3 = vld [vmem:[#allocation3 + $0x118] sm:$0xf0]  ;;  %v2919_v14 = vor.u32 %v3185_v57, %v2916_v51  ;;  %v3158_v57 = vld [vmem:[#allocation4 + $0x48] sm:$0xf0] }
 0x247   : > { %2497 = vmatpush.bf16.msra.mxu3 %v3039_v34  ;;  %v1696_v63 = vsel %vm1693_vm13, %v1649_v2, %v1695_v22  ;;  %v1704_v29 = vsel %vm1693_vm13, %v4661_v17, %v1703_v54  ;;  %v3189_v17 = vld [vmem:[#allocation3 + $0xa4] sm:$0xf]  ;;  %v3122_v15 = vld [vmem:[#allocation3 + $0x220] sm:$0xf]  ;;  %v3007_v2 = vor.u32 %v3207_v62, %v3004_v20  ;;  %v3092_v20 = vld [vmem:[#allocation3 + $0x1e8] sm:$0xf0] }
 0x248   : > { %1718 = vst [vmem:[#allocation3 + $0x208] sm:$0xff] %v1696_v63  ;;  %v2935_v53 = vor.u32 %v3189_v17, %v2932_v52  ;;  %v3237_v40 = vld [vmem:[#allocation3 + $0x224] sm:$0xf]  ;;  %v3076_v62 = vld [vmem:[#allocation3 + $0x1c8] sm:$0xf0] }
 0x249   : > { %1722 = vst [vmem:[#allocation3 + $0x228] sm:$0xff] %v1704_v29  ;;  %v3205_v34 = vld [vmem:[#allocation3 + $0x124] sm:$0xf]  ;;  %v2991_v29 = vor.u32 %v3203_v27, %v2988_v3  ;;  %v3060_v3 = vld [vmem:[#allocation3 + $0x1a8] sm:$0xf0] }
 0x24a   : > { %2471 = vmatpush.bf16.msra.mxu2 %v2951_v13  ;;  %v2999_v37 = vor.u32 %v3205_v34, %v2996_v50  ;;  %v2818_v13 = vld [vmem:[#allocation4 + $0x58] sm:$0xf]  ;;  %v3165_v34 = vld [vmem:[#allocation4 + $0x84] sm:$0xf] }
 0x24b   : > { %2498 = vmatpush.bf16.msra.mxu3 %v3031_v18  ;;  %v1657_v45 = vpop.permute.xlu1 %1656  ;;  %v3235_v18 = vld [vmem:[#allocation3 + $0x214] sm:$0xf]  ;;  %v4711_v63 = vor.u32 %v3162_v31, %v2818_v13  ;;  %v2843_v50 = vor.u32 %v3165_v34, %v2840_v44  ;;  %2462 = vmatmul.bf16.gmra.mxu1 %v4630_v9  ;;  %v3217_v31 = vld [vmem:[#allocation3 + $0x184] sm:$0xf]  ;;  %v2846_v9 = vld [vmem:[#allocation4 + $0x88] sm:$0xf] }
 0x24c   : > { %v1682_v32 = vrot.slane %v1657_v45, 4 }
 0x24d   : > { %2365 = vmatmul.bf16.gmra.mxu2 %v4697_v4 }
 0x24e   : > { %2472 = vmatpush.bf16.msra.mxu2 %v2943_v0  ;;  %v1699_v24 = vsel %vm518_vm0, %v1682_v32, %v1683_v35  ;;  %v3160_v0 = vld [vmem:[#allocation4 + $0x5c] sm:$0xf] }
 0x24f   : > { %2499 = vmatpush.bf16.msra.mxu3 %v3023_v55  ;;  %v1700_v58 = vsel %vm1693_vm13, %v1657_v45, %v1699_v24  ;;  %v3234_v52 = vld [vmem:[#allocation3 + $0x204] sm:$0xf0]  ;;  %v2786_v45 = vld [vmem:[#allocation4 + $0x10] sm:$0xf]  ;;  %v3108_v17 = vld [vmem:[#allocation3 + $0x208] sm:$0xf0]  ;;  %v3103_v24 = vor.u32 %v3231_v25, %v3100_v10  ;;  %v4714_v26 = vor.u32 %v3160_v0, %v2820_v48 }
 0x250   : > { %1720 = vst [vmem:[#allocation3 + $0x218] sm:$0xff] %v1700_v58  ;;  %v3238_v36 = vld [vmem:[#allocation3 + $0x224] sm:$0xf0]  ;;  %v3124_v61 = vld [vmem:[#allocation3 + $0x228] sm:$0xf0]  ;;  %v3095_v58 = vor.u32 %v3229_v11, %v3092_v20 }
 0x251   : > { %v3123_v39 = vor.u32 %v3238_v36, %v3122_v15  ;;  %v3127_v16 = vor.u32 %v3237_v40, %v3124_v61  ;;  %v3084_v15 = vld [vmem:[#allocation3 + $0x1d8] sm:$0xf0]  ;;  %v2838_v40 = vld [vmem:[#allocation4 + $0x80] sm:$0xf]  ;;  %v3227_v36 = vld [vmem:[#allocation3 + $0x1d4] sm:$0xf] }
 0x252   : > { %2473 = vmatpush.bf16.msra.mxu2 %v2935_v53  ;;  %v3087_v61 = vor.u32 %v3227_v36, %v3084_v15 }
 0x253   : > { %2500 = vmatpush.bf16.msra.mxu3 %v3015_v7  ;;  %2415 = vmatpush.bf16.msrb.mxu0 %v3123_v39  ;;  %v1647_v43 = vpop.permute.xlu1 %1646  ;;  %v2787_v7 = vor.u32 %v3153_v6, %v2786_v45  ;;  %v2839_v39 = vor.u32 %v3167_v19, %v2838_v40 }
 0x254   : > { %2560 = vmatpush.bf16.msra.mxu1 %v3127_v16  ;;  %v1677_v21 = vrot.slane %v1647_v43, 4  ;;  %v3225_v16 = vld [vmem:[#allocation3 + $0x1c4] sm:$0xf]  ;;  %v2806_v43 = vld [vmem:[#allocation4 + $0x38] sm:$0xf] }
 0x255   : > { %v2807_v51 = vor.u32 %v3158_v57, %v2806_v43 }
 0x256   : > { %2474 = vmatpush.bf16.msra.mxu2 %v2927_v41  ;;  %v1692_v47 = vsel %vm518_vm0, %v1676_v33, %v1677_v21  ;;  %2394 = vmatmul.bf16.gmra.mxu3 %v4703_v12  ;;  %v3079_v41 = vor.u32 %v3225_v16, %v3076_v62  ;;  %v3223_v33 = vld [vmem:[#allocation3 + $0x1b4] sm:$0xf] }
 0x257   : > { %2501 = vmatpush.bf16.msra.mxu3 %v3007_v2  ;;  %v1694_v22 = vsel %vm1693_vm13, %v4681_v42, %v1692_v47  ;;  %v3236_v54 = vld [vmem:[#allocation3 + $0x214] sm:$0xf0]  ;;  %v3116_v46 = vld [vmem:[#allocation3 + $0x218] sm:$0xf0]  ;;  %v3201_v42 = vld [vmem:[#allocation3 + $0x104] sm:$0xf] }
 0x258   : > { %1717 = vst [vmem:[#allocation3 + $0x200] sm:$0xff] %v1694_v22  ;;  %v3115_v1 = vor.u32 %v3236_v54, %v3114_v8  ;;  %v3119_v59 = vor.u32 %v3235_v18, %v3116_v46  ;;  %v2983_v55 = vor.u32 %v3201_v42, %v2980_v23  ;;  %v3068_v2 = vld [vmem:[#allocation3 + $0x1b8] sm:$0xf0]  ;;  %v3221_v47 = vld [vmem:[#allocation3 + $0x1a4] sm:$0xf] }
 0x259   : > { %v3071_v21 = vor.u32 %v3223_v33, %v3068_v2  ;;  %v3052_v8 = vld [vmem:[#allocation3 + $0x198] sm:$0xf0]  ;;  %v3044_v22 = vld [vmem:[#allocation3 + $0x188] sm:$0xf0]  ;;  %v2826_v18 = vld [vmem:[#allocation4 + $0x60] sm:$0xf] }
 0x25a   : > { %2475 = vmatpush.bf16.msra.mxu2 %v2919_v14  ;;  %2416 = vmatpush.bf16.msrb.mxu0 %v3115_v1  ;;  %v3063_v14 = vor.u32 %v3221_v47, %v3060_v3  ;;  %v3047_v54 = vor.u32 %v3217_v31, %v3044_v22  ;;  %v3163_v46 = vld [vmem:[#allocation4 + $0x70] sm:$0xf0] }
 0x25b   : > { %2502 = vmatpush.bf16.msra.mxu3 %v2999_v37  ;;  %2561 = vmatpush.bf16.msra.mxu1 %v3119_v59  ;;  %v3219_v37 = vld [vmem:[#allocation3 + $0x194] sm:$0xf]  ;;  %v2827_v1 = vor.u32 %v3163_v46, %v2826_v18  ;;  %v3168_v59 = vld [vmem:[#allocation4 + $0x98] sm:$0xf0] }
 0x25c   : > { %v3055_v13 = vor.u32 %v3219_v37, %v3052_v8  ;;  %v2847_v27 = vor.u32 %v3168_v59, %v2846_v9 }
 0x25d   : > { %2370 = vmatmul.bf16.gmra.mxu2 %v4711_v63 }
 0x25f   : > { %2503 = vmatpush.bf16.msra.mxu3 %v2991_v29  ;;  %v3106_v35 = vld [vmem:[#allocation3 + $0x200] sm:$0xf]  ;;  %v3233_v32 = vld [vmem:[#allocation3 + $0x204] sm:$0xf] }
 0x260   : > { %v3107_v53 = vor.u32 %v3234_v52, %v3106_v35  ;;  %v3111_v30 = vor.u32 %v3233_v32, %v3108_v17 }
 0x262   : > { %2417 = vmatpush.bf16.msrb.mxu0 %v3107_v53  ;;  %2562 = vmatpush.bf16.msra.mxu1 %v3111_v30 }
 0x263   : > { %2504 = vmatpush.bf16.msra.mxu3 %v2983_v55 }
 0x265   : > { %3136 = vmatmul.msk.bf16.vlgmr.msrb.gmra.mxu0 %vm2281_vm14, %v2787_v7  ;;  %3140 = vmatmul.msk.bf16.vlgmr.msra.gmra.mxu1 %vm2281_vm14, %v2787_v7 }
 0x266   : > { %2526 = vmatpush.bf16.msra.mxu0 %v3103_v24  ;;  %2399 = vmatmul.bf16.gmra.mxu3 %v4714_v26 }
 0x26a   : > { %2527 = vmatpush.bf16.msra.mxu0 %v3095_v58 }
 0x26c   : > { %v4732_v23 = vpop.f32.mrf.mxu3 }
 0x26d   : > { %2375 = vmatmul.bf16.gmra.mxu2 %v2839_v39 }
 0x26e   : > { %2528 = vmatpush.bf16.msra.mxu0 %v3087_v61 }
 0x272   : > { %2529 = vmatpush.bf16.msra.mxu0 %v3079_v41 }
 0x275   : > { %3137 = vmatmul.msk.bf16.gmra.mxu0 %vm2281_vm14, %v2807_v51  ;;  %3141 = vmatmul.msk.bf16.gmra.mxu1 %vm2281_vm14, %v2807_v51 }
 0x276   : > { %2530 = vmatpush.bf16.msra.mxu0 %v3071_v21  ;;  %2404 = vmatmul.bf16.gmra.mxu3 %v2843_v50 }
 0x278   : > { %v2332_v29 = vpop.f32.mrf.mxu1 }
 0x27a   : > { %2531 = vmatpush.bf16.msra.mxu0 %v3063_v14 }
 0x27d   : > { %2476 = vmatmul.bf16.vlgmr.msra.gmra.mxu2 %v4634_v28  ;;  %v4729_v28 = vpop.f32.mrf.mxu2 }
 0x27e   : > { %2532 = vmatpush.bf16.msra.mxu0 %v3055_v13  ;;  %v2343_v22 = vadd.f32 %v4732_v23, %v4729_v28 }
 0x282   : > { %2533 = vmatpush.bf16.msra.mxu0 %v3047_v54 }
 0x285   : > { %3138 = vmatmul.msk.bf16.gmra.mxu0 %vm2281_vm14, %v2827_v1  ;;  %v4734_v10 = vpop.f32.mrf.mxu2  ;;  %3142 = vmatmul.msk.bf16.gmra.mxu1 %vm2281_vm14, %v2827_v1 }
 0x286   : > { %2505 = vmatmul.bf16.vlgmr.msra.gmra.mxu3 %v4679_v56  ;;  %v4739_v56 = vpop.f32.mrf.mxu3 }
 0x288   : > { %v2303_v0 = vpop.f32.mrf.mxu0 }
 0x289   : > { %v2333_v24 = vadd.f32 %v2332_v29, %v2303_v0 }
 0x28d   : > { %2481 = vmatmul.bf16.gmra.mxu2 %v4667_v49  ;;  %v2334_v49 = vpop.f32.mrf.mxu1  ;;  %v4741_v42 = vpop.f32.mrf.mxu2 }
 0x290   : > { %v2305_v52 = vpop.f32.mrf.mxu0 }
 0x291   : > { %v2335_v19 = vadd.f32 %v2334_v49, %v2305_v52 }
 0x295   : > { %3139 = vmatmul.msk.bf16.gmra.mxu0 %vm2281_vm14, %v2847_v27  ;;  %3143 = vmatmul.msk.bf16.gmra.mxu1 %vm2281_vm14, %v2847_v27  ;;  %v2345_v27 = vadd.f32 %v4739_v56, %v4734_v10 }
 0x296   : > { %2510 = vmatmul.bf16.gmra.mxu3 %v4697_v4  ;;  %v2337_v4 = vpop.f32.mrf.mxu1 }
 0x29d   : > { %2486 = vmatmul.bf16.gmra.mxu2 %v4623_v60  ;;  %v4745_v60 = vpop.f32.mrf.mxu3 }
 0x29e   : > { %v2339_v48 = vpop.f32.mrf.mxu1  ;;  %v2348_v23 = vadd.f32 %v4745_v60, %v4741_v42 }
 0x2a5   : > { %2534 = vmatmul.bf16.vlgmr.msra.gmra.mxu0 %v4687_v5  ;;  %v4748_v5 = vpop.f32.mrf.mxu2 }
 0x2a6   : > { %2515 = vmatmul.bf16.gmra.mxu3 %v4711_v63  ;;  %v4750_v63 = vpop.f32.mrf.mxu3 }
 0x2a7   : > { %v2308_v6 = vpop.f32.mrf.mxu0  ;;  %v2350_v56 = vadd.f32 %v4750_v63, %v4748_v5 }
 0x2a8   : > { %v2338_v41 = vadd.f32 %v2337_v4, %v2308_v6 }
 0x2ad   : > { %2491 = vmatmul.bf16.gmra.mxu2 %v4642_v38  ;;  %v4753_v38 = vpop.f32.mrf.mxu1 }
 0x2af   : > { %v2310_v30 = vpop.f32.mrf.mxu0 }
 0x2b5   : > { %2539 = vmatmul.bf16.gmra.mxu0 %v4703_v12  ;;  %v4755_v35 = vpop.f32.mrf.mxu1 }
 0x2b6   : > { %2520 = vmatmul.bf16.gmra.mxu3 %v2839_v39 }
 0x2bd   : > { %v4757_v25 = vpop.f32.mrf.mxu1 }
 0x2c0   : > { %v2361_v55 = vpop.f32.mrf.mxu2 }
 0x2c1   : > { %v2362_v20 = vadd.f32 %v2361_v55, %v2333_v24 }
 0x2c5   : > { %2544 = vmatmul.bf16.gmra.mxu0 %v4714_v26  ;;  %v4760_v40 = vpop.f32.mrf.mxu1 }
 0x2c8   : > { %v2363_v45 = vpop.f32.mrf.mxu2 }
 0x2c9   : > { %v2390_v12 = vpop.f32.mrf.mxu3  ;;  %v2364_v61 = vadd.f32 %v2363_v45, %v2335_v19 }
 0x2ca   : > { %v2391_v26 = vadd.f32 %v2390_v12, %v2362_v20 }
 0x2cd   : > { %v4766_v43 = vpop.f32.mrf.mxu1 }
 0x2d0   : > { %v2366_v17 = vpop.f32.mrf.mxu2 }
 0x2d1   : > { %v2392_v32 = vpop.f32.mrf.mxu3  ;;  %v2367_v57 = vadd.f32 %v2366_v17, %v2338_v41 }
 0x2d2   : > { %v2393_v39 = vadd.f32 %v2392_v32, %v2364_v61 }
 0x2d5   : > { %2549 = vmatmul.bf16.gmra.mxu0 %v2843_v50  ;;  %v2340_v50 = vadd.f32 %v2339_v48, %v2310_v30  ;;  %v4769_v47 = vpop.f32.mrf.mxu1 }
 0x2d8   : > { %v2368_v7 = vpop.f32.mrf.mxu2 }
 0x2d9   : > { %v2395_v53 = vpop.f32.mrf.mxu3  ;;  %v2369_v3 = vadd.f32 %v2368_v7, %v2340_v50 }
 0x2da   : > { %v2396_v44 = vadd.f32 %v2395_v53, %v2367_v57 }
 0x2dd   : > { %v4774_v1 = vpop.f32.mrf.mxu1 }
 0x2e0   : > { %v2371_v36 = vpop.f32.mrf.mxu2 }
 0x2e1   : > { %v2397_v11 = vpop.f32.mrf.mxu3  ;;  %v2372_v54 = vadd.f32 %v2371_v36, %v2343_v22 }
 0x2e2   : > { %v2419_v58 = vpop.f32.mrf.mxu0  ;;  %v2398_v14 = vadd.f32 %v2397_v11, %v2369_v3 }
 0x2e3   : > { %v2420_v15 = vadd.f32 %v2419_v58, %v2391_v26 }
 0x2e5   : > { %2584 = vst [vmem:[%s4762_s1] sm:$0xff] %v2420_v15  ;;  %v4779_v28 = vpop.f32.mrf.mxu1 }
 0x2e8   : > { %v2373_v34 = vpop.f32.mrf.mxu2 }
 0x2e9   : > { %v2400_v16 = vpop.f32.mrf.mxu3  ;;  %v2374_v49 = vadd.f32 %v2373_v34, %v2345_v27 }
 0x2ea   : > { %v2421_v62 = vpop.f32.mrf.mxu0  ;;  %v2401_v18 = vadd.f32 %v2400_v16, %v2372_v54 }
 0x2eb   : > { %v2422_v2 = vadd.f32 %v2421_v62, %v2393_v39 }
 0x2ed   : > { %2586 = vst [vmem:[%s4762_s1 + $0x10] sm:$0xff] %v2422_v2  ;;  %v2564_v32 = vpop.f32.mrf.mxu1 }
 0x2f0   : > { %v2376_v37 = vpop.f32.mrf.mxu2 }
 0x2f1   : > { %v2402_v33 = vpop.f32.mrf.mxu3  ;;  %v2377_v52 = vadd.f32 %v2376_v37, %v2348_v23 }
 0x2f2   : > { %v2424_v21 = vpop.f32.mrf.mxu0  ;;  %v2403_v4 = vadd.f32 %v2402_v33, %v2374_v49 }
 0x2f3   : > { %v2425_v51 = vadd.f32 %v2424_v21, %v2396_v44 }
 0x2f5   : > { %2588 = vst [vmem:[%s4762_s1 + $0x20] sm:$0xff] %v2425_v51  ;;  %v2566_v20 = vpop.f32.mrf.mxu1 }
 0x2f8   : > { %v2378_v59 = vpop.f32.mrf.mxu2 }
 0x2f9   : > { %v2405_v31 = vpop.f32.mrf.mxu3  ;;  %v2379_v17 = vadd.f32 %v2378_v59, %v2350_v56 }
 0x2fa   : > { %v2426_v8 = vpop.f32.mrf.mxu0  ;;  %v2406_v12 = vadd.f32 %v2405_v31, %v2377_v52 }
 0x2fb   : > { %v2427_v13 = vadd.f32 %v2426_v8, %v2398_v14 }
 0x2fd   : > { %2590 = vst [vmem:[%s4762_s1 + $0x30] sm:$0xff] %v2427_v13  ;;  %v2569_v39 = vpop.f32.mrf.mxu1 }
 0x300   : > { %v2477_v55 = vpop.f32.mrf.mxu2 }
 0x301   : > { %v2407_v29 = vpop.f32.mrf.mxu3  ;;  %v2478_v60 = vadd.f32 %v2477_v55, %v4753_v38 }
 0x302   : > { %v2429_v46 = vpop.f32.mrf.mxu0  ;;  %v2408_v30 = vadd.f32 %v2407_v29, %v2379_v17 }
 0x303   : > { %v2430_v9 = vadd.f32 %v2429_v46, %v2401_v18 }
 0x305   : > { %2592 = vst [vmem:[%s4762_s1 + $0x40] sm:$0xff] %v2430_v9  ;;  %v2571_v33 = vpop.f32.mrf.mxu1 }
 0x308   : > { %v2479_v53 = vpop.f32.mrf.mxu2 }
 0x309   : > { %v2506_v45 = vpop.f32.mrf.mxu3  ;;  %v2480_v63 = vadd.f32 %v2479_v53, %v4755_v35 }
 0x30a   : > { %v2431_v0 = vpop.f32.mrf.mxu0  ;;  %v2507_v26 = vadd.f32 %v2506_v45, %v2478_v60 }
 0x30b   : > { %v2432_v48 = vadd.f32 %v2431_v0, %v2403_v4 }
 0x30d   : > { %2594 = vst [vmem:[%s4762_s1 + $0x50] sm:$0xff] %v2432_v48  ;;  %v2574_v13 = vpop.f32.mrf.mxu1 }
 0x310   : > { %v2482_v11 = vpop.f32.mrf.mxu2 }
 0x311   : > { %v2508_v24 = vpop.f32.mrf.mxu3  ;;  %v2483_v38 = vadd.f32 %v2482_v11, %v4757_v25 }
 0x312   : > { %v2434_v6 = vpop.f32.mrf.mxu0  ;;  %v2509_v36 = vadd.f32 %v2508_v24, %v2480_v63 }
 0x313   : > { %v2435_v10 = vadd.f32 %v2434_v6, %v2406_v12 }
 0x315   : > { %2596 = vst [vmem:[%s4762_s1 + $0x60] sm:$0xff] %v2435_v10  ;;  %v2576_v59 = vpop.f32.mrf.mxu1 }
 0x318   : > { %v2484_v62 = vpop.f32.mrf.mxu2 }
 0x319   : > { %v2511_v19 = vpop.f32.mrf.mxu3  ;;  %v2485_v35 = vadd.f32 %v2484_v62, %v4760_v40 }
 0x31a   : > { %v2436_v7 = vpop.f32.mrf.mxu0  ;;  %v2512_v57 = vadd.f32 %v2511_v19, %v2483_v38 }
 0x31b   : > { %v2437_v42 = vadd.f32 %v2436_v7, %v2408_v30 }
 0x31d   : > { %2598 = vst [vmem:[%s4762_s1 + $0x70] sm:$0xff] %v2437_v42  ;;  %v2579_v55 = vpop.f32.mrf.mxu1 }
 0x320   : > { %v2487_v51 = vpop.f32.mrf.mxu2 }
 0x321   : > { %v2513_v2 = vpop.f32.mrf.mxu3  ;;  %v2488_v25 = vadd.f32 %v2487_v51, %v4766_v43 }
 0x322   : > { %v2535_v58 = vpop.f32.mrf.mxu0  ;;  %v2514_v3 = vadd.f32 %v2513_v2, %v2485_v35 }
 0x323   : > { %v2536_v15 = vadd.f32 %v2535_v58, %v2507_v26 }
 0x325   : > { %v2565_v5 = vadd.f32 %v2564_v32, %v2536_v15  ;;  %v2581_v17 = vpop.f32.mrf.mxu1 }
 0x327   : > { %2585 = vst [vmem:[%s4762_s1 + $0x8] sm:$0xff] %v2565_v5 }
 0x328   : > { %v2489_v31 = vpop.f32.mrf.mxu2 }
 0x329   : > { %v2516_v50 = vpop.f32.mrf.mxu3  ;;  %v2490_v40 = vadd.f32 %v2489_v31, %v4769_v47 }
 0x32a   : > { %v2537_v61 = vpop.f32.mrf.mxu0  ;;  %v2517_v22 = vadd.f32 %v2516_v50, %v2488_v25 }
 0x32b   : > { %v2538_v16 = vadd.f32 %v2537_v61, %v2509_v36 }
 0x32d   : > { %v2567_v41 = vadd.f32 %v2566_v20, %v2538_v16 }
 0x32f   : > { %2587 = vst [vmem:[%s4762_s1 + $0x18] sm:$0xff] %v2567_v41 }
 0x330   : > { %v2492_v29 = vpop.f32.mrf.mxu2 }
 0x331   : > { %v2518_v54 = vpop.f32.mrf.mxu3  ;;  %v2493_v48 = vadd.f32 %v2492_v29, %v4774_v1 }
 0x332   : > { %v2540_v34 = vpop.f32.mrf.mxu0  ;;  %v2519_v27 = vadd.f32 %v2518_v54, %v2490_v40 }
 0x333   : > { %v2541_v44 = vadd.f32 %v2540_v34, %v2512_v57 }
 0x335   : > { %v2570_v21 = vadd.f32 %v2569_v39, %v2541_v44 }
 0x337   : > { %2589 = vst [vmem:[%s4762_s1 + $0x28] sm:$0xff] %v2570_v21 }
 0x338   : > { %v2494_v12 = vpop.f32.mrf.mxu2 }
 0x339   : > { %v2521_v0 = vpop.f32.mrf.mxu3  ;;  %v2495_v10 = vadd.f32 %v2494_v12, %v4779_v28 }
 0x33a   : > { %v2542_v14 = vpop.f32.mrf.mxu0  ;;  %v2522_v23 = vadd.f32 %v2521_v0, %v2493_v48 }
 0x33b   : > { %v2543_v37 = vadd.f32 %v2542_v14, %v2514_v3 }
 0x33d   : > { %v2572_v8 = vadd.f32 %v2571_v33, %v2543_v37 }
 0x33f   : > { %2591 = vst [vmem:[%s4762_s1 + $0x38] sm:$0xff] %v2572_v8 }
 0x341   : > { %v2523_v6 = vpop.f32.mrf.mxu3 }
 0x342   : > { %v2545_v18 = vpop.f32.mrf.mxu0  ;;  %v2524_v1 = vadd.f32 %v2523_v6, %v2495_v10 }
 0x343   : > { %v2546_v46 = vadd.f32 %v2545_v18, %v2517_v22 }
 0x345   : > { %v2575_v9 = vadd.f32 %v2574_v13, %v2546_v46 }
 0x347   : > { %2593 = vst [vmem:[%s4762_s1 + $0x48] sm:$0xff] %v2575_v9 }
 0x34a   : > { %v2547_v49 = vpop.f32.mrf.mxu0 }
 0x34b   : > { %v2548_v4 = vadd.f32 %v2547_v49, %v2519_v27 }
 0x34d   : > { %v2577_v43 = vadd.f32 %v2576_v59, %v2548_v4 }
 0x34f   : > { %2595 = vst [vmem:[%s4762_s1 + $0x58] sm:$0xff] %v2577_v43 }
 0x352   : > { %v2550_v52 = vpop.f32.mrf.mxu0 }
 0x353   : > { %v2551_v45 = vadd.f32 %v2550_v52, %v2522_v23 }
 0x355   : > { %v2580_v47 = vadd.f32 %v2579_v55, %v2551_v45 }
 0x357   : > { %2597 = vst [vmem:[%s4762_s1 + $0x68] sm:$0xff] %v2580_v47 }
 0x35a   : > { %v2552_v56 = vpop.f32.mrf.mxu0 }
 0x35b   : > { %v2553_v32 = vadd.f32 %v2552_v56, %v2524_v1 }
 0x35d   : > { %v2582_v53 = vadd.f32 %v2581_v17, %v2553_v32 }
 0x35f   : > { %2599 = vst [vmem:[%s4762_s1 + $0x78] sm:$0xff] %v2582_v53 }
 0x360   : > { %3501 = shalt.err (!%p3498_p13)
}
 0x361   : > { %s3583_s0 = smov 256  }
 0x362   : > { %3267 = dma.vmem_to_hbm [thread:$0]  (%p3703_p0), %s2616_s9, 2048, %s2618_s14, %s2601_s18, %s3583_s0, %s3583_s0, %s3571_s26  }
 0x363 PF: > { %s2632_s10 = sand.u32 1, %s3540_s15   ;;  %p3281_p4 = pnand %p2758_p3, %p3707_p2 }
 0x364   : > { %s2633_s12 = scalar_lea.sflag [#allocation6], %s2632_s10 }
 0x365   : > { %p3282_p5 = pneg %p3281_p4 }
 0x367   : > { %3535 = dma.done.wait (%p3282_p5), %s2633_s12, 2048  }
 0x368   : > { %3537 = vsyncadd (%p3282_p5), %s2633_s12, 4294965248  ;;  %s21_s20 = sadd.s32 1, %s3560_s20   ;;  %s4878_s30 = sld [smem:[#allocation14_spill]] }
 0x369   : > { %p18_p1 = scmp.ge.s32.totalorder %s21_s20, 4   ;;  %s4879_s15 = smov %s3544_s16 }
 0x36a   : > { %s4880_s16 = smov %s3548_s17  ;;  %s4881_s17 = smov %s3661_s28 }
 0x36b   : > { %s4882_s18 = smov %s3556_s19  ;;  %20 = sbr.rel (!%p18_p1) target bundleno = 10 (0xa), region = 100 }
 0x36e   : > { %s4883_s19 = smov %s4878_s30 }
 0x370   :  { %2639 = vsyncpa [#allocation5], 1 }
 0x371   :  { %2641 = vsyncpa [#allocation5 + $0x1], 1 }
 0x372   :  { %2642 = vsyncpa [#allocation8], 1 }
 0x373   :  { %2644 = vsyncpa [#allocation8 + $0x1], 1 }
 0x374   :  { %2645 = vsyncpa [#allocation6], 1 }
 0x375   :  { %2647 = vsyncpa [#allocation6 + $0x1], 1 }

</bundles_post_ra>
